<compile_context>
chip_gen: v6e
topology: v6e:2x2x1
jax: 0.10.0
libtpu: 0.0.40
codegen_flags: <defaults>
</compile_context>

<pallas_src>
import math
from functools import partial

import jax
import jax.numpy as jnp
from jax import lax
from jax.experimental import pallas as pl
from jax.experimental.pallas import tpu as pltpu

EPS = 1e-5  # PyTorch LayerNorm default eps


# --------------------------------------------------------------------------------------
# Fused forward kernel: single grid step, whole batch, full network.
# --------------------------------------------------------------------------------------
def _layer_norm(x, gamma, beta):
    d = x.shape[-1]
    mu = jnp.sum(x, axis=-1, keepdims=True) * (1.0 / d)
    xc = x - mu
    var = jnp.sum(xc * xc, axis=-1, keepdims=True) * (1.0 / d)
    return xc * lax.rsqrt(var + EPS) * gamma + beta


def fused_forward_kernel(patches_ref, w_misc_ref, v_front_ref, mask_ref,
                         w_lay_ref, w_ffn2_ref, v_lay_ref, o_ref,
                         *, n_layers, n_head, seq_len, batch, d_model, d_hid, cin_pad):
    bf16, f32 = jnp.bfloat16, jnp.float32
    S, B, H, D = seq_len, batch, n_head, d_model
    dh = D // H
    BS = B * S

    # ---- unpack the consolidated constant slabs (static slices, held in vregs) ----
    wm = w_misc_ref[...]                                  # bf16 [cin_pad + 3D, D]
    wc = wm[0:cin_pad, :]                                 # conv (im2col) weight
    wl = wm[cin_pad:cin_pad + D, :]                       # liniar_in weight
    wd1 = wm[cin_pad + D:cin_pad + 2 * D, :]              # decoder lin1 (lane-padded)
    wd2 = wm[cin_pad + 2 * D:cin_pad + 3 * D, :]          # decoder lin2 (row/lane-padded)

    vf = v_front_ref[...]                                 # f32 [4 + B*S, D]
    bc, bl, bd1, bd2 = vf[0:1, :], vf[1:2, :], vf[2:3, :], vf[3:4, :]
    pe = vf[4:4 + BS, :]                                  # positional encoding, batch-tiled

    # ---- conv (im2col matmul) + ReLU -> liniar_in -> + positional encoding ----
    h = jnp.dot(patches_ref[...].astype(bf16), wc, preferred_element_type=f32) + bc
    h = jnp.maximum(h, 0.0)                               # ReLU after conv
    # dropout layers (self.dropf / pos_encoder.dropf) are identity in eval mode
    x = jnp.dot(h.astype(bf16), wl, preferred_element_type=f32) + bl + pe     # [B*S, D]

    mask = mask_ref[...]                                  # [H*B*S, H*B*S] block-diag additive

    # ---- post-norm TransformerEncoder layers ----
    for l in range(n_layers):
        wa = w_lay_ref[l]                                 # bf16 [D, 3D + D + d_hid]
        wqkv = wa[:, 0:3 * D]
        wo = wa[:, 3 * D:4 * D]
        w1 = wa[:, 4 * D:4 * D + d_hid]
        w2 = w_ffn2_ref[l]                                # bf16 [d_hid, D]

        vl = v_lay_ref[l]                                 # f32 [8, max(3D, d_hid)]
        bqkv = vl[0:1, 0:3 * D]
        b1 = vl[1:2, 0:d_hid]
        bo = vl[2:3, 0:D]
        g1 = vl[3:4, 0:D]
        be1 = vl[4:5, 0:D]
        b2 = vl[5:6, 0:D]
        g2 = vl[6:7, 0:D]
        be2 = vl[7:8, 0:D]

        # fused Q/K/V projection (1/sqrt(dh) pre-folded into the Q columns)
        qkv = jnp.dot(x.astype(bf16), wqkv, preferred_element_type=f32) + bqkv   # [B*S, 3D]

        # stack heads on the sublane axis: rows ordered (head, batch, seq)
        q_all = jnp.concatenate([qkv[:, h * dh:(h + 1) * dh] for h in range(H)], axis=0)
        k_all = jnp.concatenate([qkv[:, D + h * dh:D + (h + 1) * dh] for h in range(H)], axis=0)
        v_all = jnp.concatenate([qkv[:, 2 * D + h * dh:2 * D + (h + 1) * dh] for h in range(H)], axis=0)

        # all heads x all batch elements in ONE scores matmul + block-diag mask + ONE softmax
        s_all = lax.dot_general(q_all.astype(bf16), k_all.astype(bf16),
                                (((1,), (1,)), ((), ())),
                                preferred_element_type=f32) + mask               # [H*BS, H*BS]
        m = jnp.max(s_all, axis=-1, keepdims=True)        # row max is inside the valid block
        e = jnp.exp(s_all - m)
        p = e * pl.reciprocal(jnp.sum(e, axis=-1, keepdims=True), approx=True)
        o_all = jnp.dot(p.astype(bf16), v_all.astype(bf16),
                        preferred_element_type=f32)                              # [H*BS, dh]

        # regroup (head, batch*seq, dh) -> (batch*seq, head*dh); single out-proj with full Wo
        o_re = jnp.concatenate([o_all[h * BS:(h + 1) * BS, :] for h in range(H)], axis=1)
        attn = jnp.dot(o_re.astype(bf16), wo, preferred_element_type=f32) + bo   # [B*S, D]

        # residual + LayerNorm1
        xn = _layer_norm(x + attn, g1, be1)

        # feed-forward (ReLU activation, TransformerEncoderLayer default)
        f = jnp.maximum(jnp.dot(xn.astype(bf16), w1, preferred_element_type=f32) + b1, 0.0)
        f = jnp.dot(f.astype(bf16), w2, preferred_element_type=f32) + b2

        # residual + LayerNorm2
        x = _layer_norm(xn + f, g2, be2)

    # ---- decoder: Linear(D,10)->ReLU->Linear(10,3)->ReLU->Softmax(dim=1 over SEQ) ----
    d1 = jnp.maximum(jnp.dot(x.astype(bf16), wd1, preferred_element_type=f32) + bd1, 0.0)
    d2 = jnp.maximum(jnp.dot(d1.astype(bf16), wd2, preferred_element_type=f32) + bd2, 0.0)
    rows = []
    for b in range(B):                                    # per-batch softmax over the seq axis
        blk = d2[b * S:(b + 1) * S, 0:3]                  # [S, 3]
        mx = jnp.max(blk, axis=0, keepdims=True)
        ex = jnp.exp(blk - mx)
        den = jnp.sum(ex, axis=0, keepdims=True)
        rows.append(ex[S - 1:S, :] / den)                 # exact divide for the final softmax
    o_ref[...] = jnp.concatenate(rows, axis=0)            # only output[:, -1, :] is consumed


# --------------------------------------------------------------------------------------
# Parameter init (PyTorch-layout), one-time weight packing, and the jitted forward.
# --------------------------------------------------------------------------------------
def positional_encoding(seq_len, d_model):
    # matches PositionalEncoding for even d_model
    position = jnp.arange(seq_len, dtype=jnp.float32)[:, None]
    div_term = jnp.exp(jnp.arange(0, d_model, 2, dtype=jnp.float32)
                       * (-math.log(10000.0) / d_model))
    ang = position * div_term                                             # [S, D/2]
    pe = jnp.stack([jnp.sin(ang), jnp.cos(ang)], axis=-1).reshape(seq_len, d_model)
    return pe.astype(jnp.float32)


def glorot(key, shape):
    fan_out, fan_in = shape[0], shape[1]
    std = math.sqrt(2.0 / (fan_in + fan_out))
    return (std * jax.random.normal(key, shape)).astype(jnp.float32)


def init_params(key, eeg_channel, d_model, d_hid, n_layers):
    ks = iter(jax.random.split(key, 16 + 12 * n_layers))
    nxt = lambda: next(ks)
    D, C = d_model, eeg_channel
    params = {
        "conv_w": glorot(nxt(), (D, C * 3)).reshape(D, C, 3),   # Conv2d weight (k=(3,1))
        "conv_b": 0.01 * jax.random.normal(nxt(), (D,)),
        "lin_in_w": glorot(nxt(), (D, D)),
        "lin_in_b": 0.01 * jax.random.normal(nxt(), (D,)),
        "lin1_w": glorot(nxt(), (10, D)),
        "lin1_b": 0.01 * jax.random.normal(nxt(), (10,)),
        "lin2_w": glorot(nxt(), (3, 10)),
        "lin2_b": 0.01 * jax.random.normal(nxt(), (3,)),
        "layers": [],
    }
    for _ in range(n_layers):
        params["layers"].append({
            "wqkv": glorot(nxt(), (3 * D, D)),
            "bqkv": jnp.zeros((3 * D,), jnp.float32),
            "wo": glorot(nxt(), (D, D)),
            "bo": jnp.zeros((D,), jnp.float32),
            "g1": jnp.ones((D,), jnp.float32),
            "be1": jnp.zeros((D,), jnp.float32),
            "w1": glorot(nxt(), (d_hid, D)),
            "b1": 0.01 * jax.random.normal(nxt(), (d_hid,)),
            "w2": glorot(nxt(), (D, d_hid)),
            "b2": 0.01 * jax.random.normal(nxt(), (D,)),
            "g2": jnp.ones((D,), jnp.float32),
            "be2": jnp.zeros((D,), jnp.float32),
        })
    return params


def prepare_inputs(params, n_head, seq_len, batch):
    """One-time weight packing (hoisted out of the per-call jitted forward)."""
    f32, bf16 = jnp.float32, jnp.bfloat16
    D, C = params["conv_w"].shape[0], params["conv_w"].shape[1]
    L = len(params["layers"])
    d_hid = params["layers"][0]["w1"].shape[0]
    H, S, B = n_head, seq_len, batch
    dh = D // H
    scale = 1.0 / math.sqrt(dh)
    assert D % H == 0 and D >= 10 and d_hid <= max(3 * D, d_hid)

    cin = 3 * C
    cin_pad = -(-cin // 8) * 8

    # conv / linear_in / decoder weights -> one bf16 slab [cin_pad + 3D, D]
    wc = jnp.transpose(params["conv_w"], (2, 1, 0)).reshape(cin, D)
    wc = jnp.pad(wc, ((0, cin_pad - cin), (0, 0)))
    wl = params["lin_in_w"].T
    wd1 = jnp.pad(params["lin1_w"].T, ((0, 0), (0, D - 10)))
    wd2 = jnp.pad(params["lin2_w"].T, ((0, D - 10), (0, D - 3)))
    w_misc = jnp.concatenate([wc, wl, wd1, wd2], axis=0).astype(bf16)

    # f32 front vectors: conv bias, lin_in bias, decoder biases, batch-tiled positional enc.
    bc = params["conv_b"].reshape(1, D)
    bl = params["lin_in_b"].reshape(1, D)
    bd1 = jnp.pad(params["lin1_b"].reshape(1, 10), ((0, 0), (0, D - 10)))
    bd2 = jnp.pad(params["lin2_b"].reshape(1, 3), ((0, 0), (0, D - 3)))
    pe = jnp.tile(positional_encoding(S, D), (B, 1))
    v_front = jnp.concatenate([bc, bl, bd1, bd2, pe], axis=0).astype(f32)

    # block-diagonal additive mask over the (head, batch) groups stacked on sublanes
    n_rows = H * B * S
    g = jnp.arange(n_rows) // S
    mask = jnp.where(g[:, None] == g[None, :], 0.0, -1e30).astype(f32)

    # per-layer packed weights / biases
    vw = max(3 * D, d_hid)
    w_lay, w_ffn2, v_lay = [], [], []

    def row(v):
        return jnp.pad(v.reshape(1, -1), ((0, 0), (0, vw - v.shape[-1])))

    for lp in params["layers"]:
        wqkv = lp["wqkv"].T                                  # [D, 3D]
        wqkv = wqkv.at[:, 0:D].multiply(scale)               # fold 1/sqrt(dh) into Q
        w_lay.append(jnp.concatenate([wqkv, lp["wo"].T, lp["w1"].T], axis=1))
        w_ffn2.append(lp["w2"].T)
        bqkv = lp["bqkv"].at[0:D].multiply(scale)
        v_lay.append(jnp.concatenate(
            [row(bqkv), row(lp["b1"]), row(lp["bo"]), row(lp["g1"]),
             row(lp["be1"]), row(lp["b2"]), row(lp["g2"]), row(lp["be2"])], axis=0))

    w_lay = jnp.stack(w_lay, axis=0).astype(bf16)            # [L, D, 4D + d_hid]
    w_ffn2 = jnp.stack(w_ffn2, axis=0).astype(bf16)          # [L, d_hid, D]
    v_lay = jnp.stack(v_lay, axis=0).astype(f32)             # [L, 8, vw]

    static = dict(n_layers=L, n_head=H, seq_len=S, batch=B,
                  d_model=D, d_hid=d_hid, cin_pad=cin_pad)
    return (w_misc, v_front, mask, w_lay, w_ffn2, v_lay), static


def attention_transformer_forward(prepped, x, *, n_layers, n_head, seq_len, batch,
                                  d_model, d_hid, cin_pad):
    w_misc, v_front, mask, w_lay, w_ffn2, v_lay = prepped
    B, C, T = x.shape
    S = (T - 3) // 2 + 1                                     # conv output length
    assert S == seq_len and B == batch
    cin = 3 * C

    # im2col via cheap strided slices (no gather): patches[b, t, k*C + c] = x[b, c, 2t+k]
    cols = [jnp.transpose(x[:, :, k:k + 2 * S:2], (0, 2, 1)) for k in range(3)]   # [B,S,C]
    patches = jnp.concatenate(cols, axis=-1).reshape(B * S, cin)
    patches = jnp.pad(patches, ((0, 0), (0, cin_pad - cin))).astype(jnp.float32)  # [B*S, cin_pad]

    kern = partial(fused_forward_kernel, n_layers=n_layers, n_head=n_head,
                   seq_len=seq_len, batch=batch, d_model=d_model, d_hid=d_hid,
                   cin_pad=cin_pad)

    out = pl.pallas_call(
        kern,
        out_shape=jax.ShapeDtypeStruct((B, 3), jnp.float32),
        grid=(1,),                                           # batch packed on sublanes
        in_specs=[
            pl.BlockSpec(patches.shape, lambda i: (0, 0)),
            pl.BlockSpec(w_misc.shape, lambda i: (0, 0)),
            pl.BlockSpec(v_front.shape, lambda i: (0, 0)),
            pl.BlockSpec(mask.shape, lambda i: (0, 0)),
            pl.BlockSpec(w_lay.shape, lambda i: (0, 0, 0)),
            pl.BlockSpec(w_ffn2.shape, lambda i: (0, 0, 0)),
            pl.BlockSpec(v_lay.shape, lambda i: (0, 0, 0)),
        ],
        out_specs=pl.BlockSpec((B, 3), lambda i: (0, 0)),
        compiler_params=pltpu.CompilerParams(
            dimension_semantics=("arbitrary",),
            vmem_limit_bytes=32 * 1024 * 1024),
    )(patches, w_misc, v_front, mask, w_lay, w_ffn2, v_lay)
    return out                                               # output[:, -1, :]  -> [B, 3]


if __name__ == "__main__":
    B, C, T = 2, 4, 17          # batch, eeg_channel, time -> S = (17-3)//2+1 = 8
    D, H, d_hid, n_layers = 32, 4, 64, 2
    S = (T - 3) // 2 + 1

    key = jax.random.PRNGKey(0)
    pkey, xkey = jax.random.split(key)
    params = init_params(pkey, C, D, d_hid, n_layers)
    x = jax.random.normal(xkey, (B, C, T), dtype=jnp.float32)

    # One-time weight packing (hoisted out of the per-call forward).
    prepped, static = prepare_inputs(params, n_head=H, seq_len=S, batch=B)
    prepped = jax.block_until_ready(prepped)

    fwd = jax.jit(partial(attention_transformer_forward, **static))
    out = jax.block_until_ready(fwd(prepped, x))
    assert out.shape == (B, 3) and bool(jnp.all(jnp.isfinite(out)))
    print("KERNEL_OK")
</pallas_src>

<mosaic_0001>
module attributes {stable_mosaic.version = 11 : i64} {
  func.func @fused_forward_kernel(%arg0: i32, %arg1: memref<16x16xf32, #tpu.memory_space<vmem>>, %arg2: memref<112x32xbf16, #tpu.memory_space<vmem>>, %arg3: memref<20x32xf32, #tpu.memory_space<vmem>>, %arg4: memref<64x64xf32, #tpu.memory_space<vmem>>, %arg5: memref<2x32x192xbf16, #tpu.memory_space<vmem>>, %arg6: memref<2x64x32xbf16, #tpu.memory_space<vmem>>, %arg7: memref<2x8x96xf32, #tpu.memory_space<vmem>>, %arg8: memref<2x3xf32, #tpu.memory_space<vmem>>) attributes {dimension_semantics = [#tpu.dimension_semantics<arbitrary>], iteration_bounds = array<i64: 1>, scalar_prefetch = 0 : i64, scratch_operands = 0 : i64, tpu.core_type = #tpu.core_type<tc>, window_params = [{pipeline_mode = #tpu.pipeline_mode<synchronous>, transform_indices = @transform_0, window_bounds = array<i64: 16, 16>}, {pipeline_mode = #tpu.pipeline_mode<synchronous>, transform_indices = @transform_1, window_bounds = array<i64: 112, 32>}, {pipeline_mode = #tpu.pipeline_mode<synchronous>, transform_indices = @transform_2, window_bounds = array<i64: 20, 32>}, {pipeline_mode = #tpu.pipeline_mode<synchronous>, transform_indices = @transform_3, window_bounds = array<i64: 64, 64>}, {pipeline_mode = #tpu.pipeline_mode<synchronous>, transform_indices = @transform_4, window_bounds = array<i64: 2, 32, 192>}, {pipeline_mode = #tpu.pipeline_mode<synchronous>, transform_indices = @transform_5, window_bounds = array<i64: 2, 64, 32>}, {pipeline_mode = #tpu.pipeline_mode<synchronous>, transform_indices = @transform_6, window_bounds = array<i64: 2, 8, 96>}, {pipeline_mode = #tpu.pipeline_mode<synchronous>, transform_indices = @transform_7, window_bounds = array<i64: 2, 3>}]} {
    %c0 = arith.constant 0 : index
    %c0_0 = arith.constant 0 : index
    %0 = vector.load %arg2[%c0, %c0_0] : memref<112x32xbf16, #tpu.memory_space<vmem>>, vector<112x32xbf16>
    %1 = vector.extract_strided_slice %0 {offsets = [0, 0], sizes = [16, 32], strides = [1, 1]} : vector<112x32xbf16> to vector<16x32xbf16>
    %2 = vector.extract_strided_slice %0 {offsets = [16, 0], sizes = [32, 32], strides = [1, 1]} : vector<112x32xbf16> to vector<32x32xbf16>
    %3 = vector.extract_strided_slice %0 {offsets = [48, 0], sizes = [32, 32], strides = [1, 1]} : vector<112x32xbf16> to vector<32x32xbf16>
    %4 = vector.extract_strided_slice %0 {offsets = [80, 0], sizes = [32, 32], strides = [1, 1]} : vector<112x32xbf16> to vector<32x32xbf16>
    %c0_1 = arith.constant 0 : index
    %c0_2 = arith.constant 0 : index
    %5 = vector.load %arg3[%c0_1, %c0_2] : memref<20x32xf32, #tpu.memory_space<vmem>>, vector<20x32xf32>
    %6 = vector.extract_strided_slice %5 {offsets = [0, 0], sizes = [1, 32], strides = [1, 1]} : vector<20x32xf32> to vector<1x32xf32>
    %7 = vector.extract_strided_slice %5 {offsets = [1, 0], sizes = [1, 32], strides = [1, 1]} : vector<20x32xf32> to vector<1x32xf32>
    %8 = vector.extract_strided_slice %5 {offsets = [2, 0], sizes = [1, 32], strides = [1, 1]} : vector<20x32xf32> to vector<1x32xf32>
    %9 = vector.extract_strided_slice %5 {offsets = [3, 0], sizes = [1, 32], strides = [1, 1]} : vector<20x32xf32> to vector<1x32xf32>
    %10 = vector.extract_strided_slice %5 {offsets = [4, 0], sizes = [16, 32], strides = [1, 1]} : vector<20x32xf32> to vector<16x32xf32>
    %c0_3 = arith.constant 0 : index
    %c0_4 = arith.constant 0 : index
    %11 = vector.load %arg1[%c0_3, %c0_4] : memref<16x16xf32, #tpu.memory_space<vmem>>, vector<16x16xf32>
    %12 = arith.truncf %11 : vector<16x16xf32> to vector<16x16xbf16>
    %cst = arith.constant dense<0.000000e+00> : vector<16x32xf32>
    %13 = tpu.matmul %12, %1, %cst {dimension_numbers = #tpu.dot_dimension_numbers<[1], [0], [0], [1], [0, 0, 1, 1], [], []>} : vector<16x16xbf16>, vector<16x32xbf16>, vector<16x32xf32> -> vector<16x32xf32>
    %14 = vector.broadcast %6 : vector<1x32xf32> to vector<16x32xf32>
    %15 = arith.addf %13, %14 : vector<16x32xf32>
    %cst_5 = arith.constant 0.000000e+00 : f32
    %16 = vector.broadcast %cst_5 : f32 to vector<16x32xf32>
    %17 = arith.maximumf %15, %16 : vector<16x32xf32>
    %18 = arith.truncf %17 : vector<16x32xf32> to vector<16x32xbf16>
    %cst_6 = arith.constant dense<0.000000e+00> : vector<16x32xf32>
    %19 = tpu.matmul %18, %2, %cst_6 {dimension_numbers = #tpu.dot_dimension_numbers<[1], [0], [0], [1], [0, 0, 1, 1], [], []>} : vector<16x32xbf16>, vector<32x32xbf16>, vector<16x32xf32> -> vector<16x32xf32>
    %20 = vector.broadcast %7 : vector<1x32xf32> to vector<16x32xf32>
    %21 = arith.addf %19, %20 : vector<16x32xf32>
    %22 = arith.addf %21, %10 : vector<16x32xf32>
    %c0_7 = arith.constant 0 : index
    %c0_8 = arith.constant 0 : index
    %23 = vector.load %arg4[%c0_7, %c0_8] : memref<64x64xf32, #tpu.memory_space<vmem>>, vector<64x64xf32>
    %c0_9 = arith.constant 0 : index
    %c0_10 = arith.constant 0 : index
    %c0_11 = arith.constant 0 : index
    %24 = vector.load %arg5[%c0_9, %c0_10, %c0_11] : memref<2x32x192xbf16, #tpu.memory_space<vmem>>, vector<1x32x192xbf16>
    %25 = vector.shape_cast %24 : vector<1x32x192xbf16> to vector<32x192xbf16>
    %26 = vector.extract_strided_slice %25 {offsets = [0, 0], sizes = [32, 96], strides = [1, 1]} : vector<32x192xbf16> to vector<32x96xbf16>
    %27 = vector.extract_strided_slice %25 {offsets = [0, 96], sizes = [32, 32], strides = [1, 1]} : vector<32x192xbf16> to vector<32x32xbf16>
    %28 = vector.extract_strided_slice %25 {offsets = [0, 128], sizes = [32, 64], strides = [1, 1]} : vector<32x192xbf16> to vector<32x64xbf16>
    %c0_12 = arith.constant 0 : index
    %c0_13 = arith.constant 0 : index
    %c0_14 = arith.constant 0 : index
    %29 = vector.load %arg6[%c0_12, %c0_13, %c0_14] : memref<2x64x32xbf16, #tpu.memory_space<vmem>>, vector<1x64x32xbf16>
    %30 = vector.shape_cast %29 : vector<1x64x32xbf16> to vector<64x32xbf16>
    %c0_15 = arith.constant 0 : index
    %c0_16 = arith.constant 0 : index
    %c0_17 = arith.constant 0 : index
    %31 = vector.load %arg7[%c0_15, %c0_16, %c0_17] : memref<2x8x96xf32, #tpu.memory_space<vmem>>, vector<1x8x96xf32>
    %32 = vector.shape_cast %31 : vector<1x8x96xf32> to vector<8x96xf32>
    %33 = vector.extract_strided_slice %32 {offsets = [0, 0], sizes = [1, 96], strides = [1, 1]} : vector<8x96xf32> to vector<1x96xf32>
    %34 = vector.extract_strided_slice %32 {offsets = [1, 0], sizes = [1, 64], strides = [1, 1]} : vector<8x96xf32> to vector<1x64xf32>
    %35 = vector.extract_strided_slice %32 {offsets = [2, 0], sizes = [1, 32], strides = [1, 1]} : vector<8x96xf32> to vector<1x32xf32>
    %36 = vector.extract_strided_slice %32 {offsets = [3, 0], sizes = [1, 32], strides = [1, 1]} : vector<8x96xf32> to vector<1x32xf32>
    %37 = vector.extract_strided_slice %32 {offsets = [4, 0], sizes = [1, 32], strides = [1, 1]} : vector<8x96xf32> to vector<1x32xf32>
    %38 = vector.extract_strided_slice %32 {offsets = [5, 0], sizes = [1, 32], strides = [1, 1]} : vector<8x96xf32> to vector<1x32xf32>
    %39 = vector.extract_strided_slice %32 {offsets = [6, 0], sizes = [1, 32], strides = [1, 1]} : vector<8x96xf32> to vector<1x32xf32>
    %40 = vector.extract_strided_slice %32 {offsets = [7, 0], sizes = [1, 32], strides = [1, 1]} : vector<8x96xf32> to vector<1x32xf32>
    %41 = arith.truncf %22 : vector<16x32xf32> to vector<16x32xbf16>
    %cst_18 = arith.constant dense<0.000000e+00> : vector<16x96xf32>
    %42 = tpu.matmul %41, %26, %cst_18 {dimension_numbers = #tpu.dot_dimension_numbers<[1], [0], [0], [1], [0, 0, 1, 1], [], []>} : vector<16x32xbf16>, vector<32x96xbf16>, vector<16x96xf32> -> vector<16x96xf32>
    %43 = vector.broadcast %33 : vector<1x96xf32> to vector<16x96xf32>
    %44 = arith.addf %42, %43 : vector<16x96xf32>
    %45 = vector.extract_strided_slice %44 {offsets = [0, 0], sizes = [16, 8], strides = [1, 1]} : vector<16x96xf32> to vector<16x8xf32>
    %46 = vector.extract_strided_slice %44 {offsets = [0, 8], sizes = [16, 8], strides = [1, 1]} : vector<16x96xf32> to vector<16x8xf32>
    %47 = vector.extract_strided_slice %44 {offsets = [0, 16], sizes = [16, 8], strides = [1, 1]} : vector<16x96xf32> to vector<16x8xf32>
    %48 = vector.extract_strided_slice %44 {offsets = [0, 24], sizes = [16, 8], strides = [1, 1]} : vector<16x96xf32> to vector<16x8xf32>
    %49 = tpu.concatenate %45, %46, %47, %48 in 0 : vector<16x8xf32>, vector<16x8xf32>, vector<16x8xf32>, vector<16x8xf32> -> vector<64x8xf32>
    %50 = vector.extract_strided_slice %44 {offsets = [0, 32], sizes = [16, 8], strides = [1, 1]} : vector<16x96xf32> to vector<16x8xf32>
    %51 = vector.extract_strided_slice %44 {offsets = [0, 40], sizes = [16, 8], strides = [1, 1]} : vector<16x96xf32> to vector<16x8xf32>
    %52 = vector.extract_strided_slice %44 {offsets = [0, 48], sizes = [16, 8], strides = [1, 1]} : vector<16x96xf32> to vector<16x8xf32>
    %53 = vector.extract_strided_slice %44 {offsets = [0, 56], sizes = [16, 8], strides = [1, 1]} : vector<16x96xf32> to vector<16x8xf32>
    %54 = tpu.concatenate %50, %51, %52, %53 in 0 : vector<16x8xf32>, vector<16x8xf32>, vector<16x8xf32>, vector<16x8xf32> -> vector<64x8xf32>
    %55 = vector.extract_strided_slice %44 {offsets = [0, 64], sizes = [16, 8], strides = [1, 1]} : vector<16x96xf32> to vector<16x8xf32>
    %56 = vector.extract_strided_slice %44 {offsets = [0, 72], sizes = [16, 8], strides = [1, 1]} : vector<16x96xf32> to vector<16x8xf32>
    %57 = vector.extract_strided_slice %44 {offsets = [0, 80], sizes = [16, 8], strides = [1, 1]} : vector<16x96xf32> to vector<16x8xf32>
    %58 = vector.extract_strided_slice %44 {offsets = [0, 88], sizes = [16, 8], strides = [1, 1]} : vector<16x96xf32> to vector<16x8xf32>
    %59 = tpu.concatenate %55, %56, %57, %58 in 0 : vector<16x8xf32>, vector<16x8xf32>, vector<16x8xf32>, vector<16x8xf32> -> vector<64x8xf32>
    %60 = arith.truncf %49 : vector<64x8xf32> to vector<64x8xbf16>
    %61 = arith.truncf %54 : vector<64x8xf32> to vector<64x8xbf16>
    %cst_19 = arith.constant dense<0.000000e+00> : vector<64x64xf32>
    %62 = tpu.matmul %60, %61, %cst_19 {dimension_numbers = #tpu.dot_dimension_numbers<[1], [1], [0], [0], [0, 0, 1, 0], [], []>} : vector<64x8xbf16>, vector<64x8xbf16>, vector<64x64xf32> -> vector<64x64xf32>
    %63 = arith.addf %62, %23 : vector<64x64xf32>
    %cst_20 = arith.constant dense<0xFF800000> : vector<64xf32>
    %64 = vector.multi_reduction <maximumf>, %63, %cst_20 [1] : vector<64x64xf32> to vector<64xf32>
    %65 = vector.shape_cast %64 : vector<64xf32> to vector<64x1xf32>
    %66 = vector.broadcast %65 : vector<64x1xf32> to vector<64x64xf32>
    %67 = arith.subf %63, %66 : vector<64x64xf32>
    %68 = math.exp %67 : vector<64x64xf32>
    %cst_21 = arith.constant dense<0.000000e+00> : vector<64xf32>
    %69 = vector.multi_reduction <add>, %68, %cst_21 [1] : vector<64x64xf32> to vector<64xf32>
    %70 = vector.shape_cast %69 : vector<64xf32> to vector<64x1xf32>
    %71 = tpu.reciprocal %70 {approx = true} : vector<64x1xf32> -> vector<64x1xf32>
    %72 = vector.broadcast %71 : vector<64x1xf32> to vector<64x64xf32>
    %73 = arith.mulf %68, %72 : vector<64x64xf32>
    %74 = arith.truncf %73 : vector<64x64xf32> to vector<64x64xbf16>
    %75 = arith.truncf %59 : vector<64x8xf32> to vector<64x8xbf16>
    %cst_22 = arith.constant dense<0.000000e+00> : vector<64x8xf32>
    %76 = tpu.matmul %74, %75, %cst_22 {dimension_numbers = #tpu.dot_dimension_numbers<[1], [0], [0], [1], [0, 0, 1, 1], [], []>} : vector<64x64xbf16>, vector<64x8xbf16>, vector<64x8xf32> -> vector<64x8xf32>
    %77 = vector.extract_strided_slice %76 {offsets = [0, 0], sizes = [16, 8], strides = [1, 1]} : vector<64x8xf32> to vector<16x8xf32>
    %78 = vector.extract_strided_slice %76 {offsets = [16, 0], sizes = [16, 8], strides = [1, 1]} : vector<64x8xf32> to vector<16x8xf32>
    %79 = vector.extract_strided_slice %76 {offsets = [32, 0], sizes = [16, 8], strides = [1, 1]} : vector<64x8xf32> to vector<16x8xf32>
    %80 = vector.extract_strided_slice %76 {offsets = [48, 0], sizes = [16, 8], strides = [1, 1]} : vector<64x8xf32> to vector<16x8xf32>
    %81 = tpu.concatenate %77, %78, %79, %80 in 1 : vector<16x8xf32>, vector<16x8xf32>, vector<16x8xf32>, vector<16x8xf32> -> vector<16x32xf32>
    %82 = arith.truncf %81 : vector<16x32xf32> to vector<16x32xbf16>
    %cst_23 = arith.constant dense<0.000000e+00> : vector<16x32xf32>
    %83 = tpu.matmul %82, %27, %cst_23 {dimension_numbers = #tpu.dot_dimension_numbers<[1], [0], [0], [1], [0, 0, 1, 1], [], []>} : vector<16x32xbf16>, vector<32x32xbf16>, vector<16x32xf32> -> vector<16x32xf32>
    %84 = vector.broadcast %35 : vector<1x32xf32> to vector<16x32xf32>
    %85 = arith.addf %83, %84 : vector<16x32xf32>
    %86 = arith.addf %22, %85 : vector<16x32xf32>
    %cst_24 = arith.constant dense<0.000000e+00> : vector<16xf32>
    %87 = vector.multi_reduction <add>, %86, %cst_24 [1] : vector<16x32xf32> to vector<16xf32>
    %88 = vector.shape_cast %87 : vector<16xf32> to vector<16x1xf32>
    %cst_25 = arith.constant 3.125000e-02 : f32
    %89 = vector.broadcast %cst_25 : f32 to vector<16x1xf32>
    %90 = arith.mulf %88, %89 : vector<16x1xf32>
    %91 = vector.broadcast %90 : vector<16x1xf32> to vector<16x32xf32>
    %92 = arith.subf %86, %91 : vector<16x32xf32>
    %93 = arith.mulf %92, %92 : vector<16x32xf32>
    %cst_26 = arith.constant dense<0.000000e+00> : vector<16xf32>
    %94 = vector.multi_reduction <add>, %93, %cst_26 [1] : vector<16x32xf32> to vector<16xf32>
    %95 = vector.shape_cast %94 : vector<16xf32> to vector<16x1xf32>
    %cst_27 = arith.constant 3.125000e-02 : f32
    %96 = vector.broadcast %cst_27 : f32 to vector<16x1xf32>
    %97 = arith.mulf %95, %96 : vector<16x1xf32>
    %cst_28 = arith.constant 9.99999974E-6 : f32
    %98 = vector.broadcast %cst_28 : f32 to vector<16x1xf32>
    %99 = arith.addf %97, %98 : vector<16x1xf32>
    %100 = math.rsqrt %99 : vector<16x1xf32>
    %101 = vector.broadcast %100 : vector<16x1xf32> to vector<16x32xf32>
    %102 = arith.mulf %92, %101 : vector<16x32xf32>
    %103 = vector.broadcast %36 : vector<1x32xf32> to vector<16x32xf32>
    %104 = arith.mulf %102, %103 : vector<16x32xf32>
    %105 = vector.broadcast %37 : vector<1x32xf32> to vector<16x32xf32>
    %106 = arith.addf %104, %105 : vector<16x32xf32>
    %107 = arith.truncf %106 : vector<16x32xf32> to vector<16x32xbf16>
    %cst_29 = arith.constant dense<0.000000e+00> : vector<16x64xf32>
    %108 = tpu.matmul %107, %28, %cst_29 {dimension_numbers = #tpu.dot_dimension_numbers<[1], [0], [0], [1], [0, 0, 1, 1], [], []>} : vector<16x32xbf16>, vector<32x64xbf16>, vector<16x64xf32> -> vector<16x64xf32>
    %109 = vector.broadcast %34 : vector<1x64xf32> to vector<16x64xf32>
    %110 = arith.addf %108, %109 : vector<16x64xf32>
    %cst_30 = arith.constant 0.000000e+00 : f32
    %111 = vector.broadcast %cst_30 : f32 to vector<16x64xf32>
    %112 = arith.maximumf %110, %111 : vector<16x64xf32>
    %113 = arith.truncf %112 : vector<16x64xf32> to vector<16x64xbf16>
    %cst_31 = arith.constant dense<0.000000e+00> : vector<16x32xf32>
    %114 = tpu.matmul %113, %30, %cst_31 {dimension_numbers = #tpu.dot_dimension_numbers<[1], [0], [0], [1], [0, 0, 1, 1], [], []>} : vector<16x64xbf16>, vector<64x32xbf16>, vector<16x32xf32> -> vector<16x32xf32>
    %115 = vector.broadcast %38 : vector<1x32xf32> to vector<16x32xf32>
    %116 = arith.addf %114, %115 : vector<16x32xf32>
    %117 = arith.addf %106, %116 : vector<16x32xf32>
    %cst_32 = arith.constant dense<0.000000e+00> : vector<16xf32>
    %118 = vector.multi_reduction <add>, %117, %cst_32 [1] : vector<16x32xf32> to vector<16xf32>
    %119 = vector.shape_cast %118 : vector<16xf32> to vector<16x1xf32>
    %cst_33 = arith.constant 3.125000e-02 : f32
    %120 = vector.broadcast %cst_33 : f32 to vector<16x1xf32>
    %121 = arith.mulf %119, %120 : vector<16x1xf32>
    %122 = vector.broadcast %121 : vector<16x1xf32> to vector<16x32xf32>
    %123 = arith.subf %117, %122 : vector<16x32xf32>
    %124 = arith.mulf %123, %123 : vector<16x32xf32>
    %cst_34 = arith.constant dense<0.000000e+00> : vector<16xf32>
    %125 = vector.multi_reduction <add>, %124, %cst_34 [1] : vector<16x32xf32> to vector<16xf32>
    %126 = vector.shape_cast %125 : vector<16xf32> to vector<16x1xf32>
    %cst_35 = arith.constant 3.125000e-02 : f32
    %127 = vector.broadcast %cst_35 : f32 to vector<16x1xf32>
    %128 = arith.mulf %126, %127 : vector<16x1xf32>
    %cst_36 = arith.constant 9.99999974E-6 : f32
    %129 = vector.broadcast %cst_36 : f32 to vector<16x1xf32>
    %130 = arith.addf %128, %129 : vector<16x1xf32>
    %131 = math.rsqrt %130 : vector<16x1xf32>
    %132 = vector.broadcast %131 : vector<16x1xf32> to vector<16x32xf32>
    %133 = arith.mulf %123, %132 : vector<16x32xf32>
    %134 = vector.broadcast %39 : vector<1x32xf32> to vector<16x32xf32>
    %135 = arith.mulf %133, %134 : vector<16x32xf32>
    %136 = vector.broadcast %40 : vector<1x32xf32> to vector<16x32xf32>
    %137 = arith.addf %135, %136 : vector<16x32xf32>
    %c1 = arith.constant 1 : index
    %c0_37 = arith.constant 0 : index
    %c0_38 = arith.constant 0 : index
    %138 = vector.load %arg5[%c1, %c0_37, %c0_38] : memref<2x32x192xbf16, #tpu.memory_space<vmem>>, vector<1x32x192xbf16>
    %139 = vector.shape_cast %138 : vector<1x32x192xbf16> to vector<32x192xbf16>
    %140 = vector.extract_strided_slice %139 {offsets = [0, 0], sizes = [32, 96], strides = [1, 1]} : vector<32x192xbf16> to vector<32x96xbf16>
    %141 = vector.extract_strided_slice %139 {offsets = [0, 96], sizes = [32, 32], strides = [1, 1]} : vector<32x192xbf16> to vector<32x32xbf16>
    %142 = vector.extract_strided_slice %139 {offsets = [0, 128], sizes = [32, 64], strides = [1, 1]} : vector<32x192xbf16> to vector<32x64xbf16>
    %c1_39 = arith.constant 1 : index
    %c0_40 = arith.constant 0 : index
    %c0_41 = arith.constant 0 : index
    %143 = vector.load %arg6[%c1_39, %c0_40, %c0_41] : memref<2x64x32xbf16, #tpu.memory_space<vmem>>, vector<1x64x32xbf16>
    %144 = vector.shape_cast %143 : vector<1x64x32xbf16> to vector<64x32xbf16>
    %c1_42 = arith.constant 1 : index
    %c0_43 = arith.constant 0 : index
    %c0_44 = arith.constant 0 : index
    %145 = vector.load %arg7[%c1_42, %c0_43, %c0_44] : memref<2x8x96xf32, #tpu.memory_space<vmem>>, vector<1x8x96xf32>
    %146 = vector.shape_cast %145 : vector<1x8x96xf32> to vector<8x96xf32>
    %147 = vector.extract_strided_slice %146 {offsets = [0, 0], sizes = [1, 96], strides = [1, 1]} : vector<8x96xf32> to vector<1x96xf32>
    %148 = vector.extract_strided_slice %146 {offsets = [1, 0], sizes = [1, 64], strides = [1, 1]} : vector<8x96xf32> to vector<1x64xf32>
    %149 = vector.extract_strided_slice %146 {offsets = [2, 0], sizes = [1, 32], strides = [1, 1]} : vector<8x96xf32> to vector<1x32xf32>
    %150 = vector.extract_strided_slice %146 {offsets = [3, 0], sizes = [1, 32], strides = [1, 1]} : vector<8x96xf32> to vector<1x32xf32>
    %151 = vector.extract_strided_slice %146 {offsets = [4, 0], sizes = [1, 32], strides = [1, 1]} : vector<8x96xf32> to vector<1x32xf32>
    %152 = vector.extract_strided_slice %146 {offsets = [5, 0], sizes = [1, 32], strides = [1, 1]} : vector<8x96xf32> to vector<1x32xf32>
    %153 = vector.extract_strided_slice %146 {offsets = [6, 0], sizes = [1, 32], strides = [1, 1]} : vector<8x96xf32> to vector<1x32xf32>
    %154 = vector.extract_strided_slice %146 {offsets = [7, 0], sizes = [1, 32], strides = [1, 1]} : vector<8x96xf32> to vector<1x32xf32>
    %155 = arith.truncf %137 : vector<16x32xf32> to vector<16x32xbf16>
    %cst_45 = arith.constant dense<0.000000e+00> : vector<16x96xf32>
    %156 = tpu.matmul %155, %140, %cst_45 {dimension_numbers = #tpu.dot_dimension_numbers<[1], [0], [0], [1], [0, 0, 1, 1], [], []>} : vector<16x32xbf16>, vector<32x96xbf16>, vector<16x96xf32> -> vector<16x96xf32>
    %157 = vector.broadcast %147 : vector<1x96xf32> to vector<16x96xf32>
    %158 = arith.addf %156, %157 : vector<16x96xf32>
    %159 = vector.extract_strided_slice %158 {offsets = [0, 0], sizes = [16, 8], strides = [1, 1]} : vector<16x96xf32> to vector<16x8xf32>
    %160 = vector.extract_strided_slice %158 {offsets = [0, 8], sizes = [16, 8], strides = [1, 1]} : vector<16x96xf32> to vector<16x8xf32>
    %161 = vector.extract_strided_slice %158 {offsets = [0, 16], sizes = [16, 8], strides = [1, 1]} : vector<16x96xf32> to vector<16x8xf32>
    %162 = vector.extract_strided_slice %158 {offsets = [0, 24], sizes = [16, 8], strides = [1, 1]} : vector<16x96xf32> to vector<16x8xf32>
    %163 = tpu.concatenate %159, %160, %161, %162 in 0 : vector<16x8xf32>, vector<16x8xf32>, vector<16x8xf32>, vector<16x8xf32> -> vector<64x8xf32>
    %164 = vector.extract_strided_slice %158 {offsets = [0, 32], sizes = [16, 8], strides = [1, 1]} : vector<16x96xf32> to vector<16x8xf32>
    %165 = vector.extract_strided_slice %158 {offsets = [0, 40], sizes = [16, 8], strides = [1, 1]} : vector<16x96xf32> to vector<16x8xf32>
    %166 = vector.extract_strided_slice %158 {offsets = [0, 48], sizes = [16, 8], strides = [1, 1]} : vector<16x96xf32> to vector<16x8xf32>
    %167 = vector.extract_strided_slice %158 {offsets = [0, 56], sizes = [16, 8], strides = [1, 1]} : vector<16x96xf32> to vector<16x8xf32>
    %168 = tpu.concatenate %164, %165, %166, %167 in 0 : vector<16x8xf32>, vector<16x8xf32>, vector<16x8xf32>, vector<16x8xf32> -> vector<64x8xf32>
    %169 = vector.extract_strided_slice %158 {offsets = [0, 64], sizes = [16, 8], strides = [1, 1]} : vector<16x96xf32> to vector<16x8xf32>
    %170 = vector.extract_strided_slice %158 {offsets = [0, 72], sizes = [16, 8], strides = [1, 1]} : vector<16x96xf32> to vector<16x8xf32>
    %171 = vector.extract_strided_slice %158 {offsets = [0, 80], sizes = [16, 8], strides = [1, 1]} : vector<16x96xf32> to vector<16x8xf32>
    %172 = vector.extract_strided_slice %158 {offsets = [0, 88], sizes = [16, 8], strides = [1, 1]} : vector<16x96xf32> to vector<16x8xf32>
    %173 = tpu.concatenate %169, %170, %171, %172 in 0 : vector<16x8xf32>, vector<16x8xf32>, vector<16x8xf32>, vector<16x8xf32> -> vector<64x8xf32>
    %174 = arith.truncf %163 : vector<64x8xf32> to vector<64x8xbf16>
    %175 = arith.truncf %168 : vector<64x8xf32> to vector<64x8xbf16>
    %cst_46 = arith.constant dense<0.000000e+00> : vector<64x64xf32>
    %176 = tpu.matmul %174, %175, %cst_46 {dimension_numbers = #tpu.dot_dimension_numbers<[1], [1], [0], [0], [0, 0, 1, 0], [], []>} : vector<64x8xbf16>, vector<64x8xbf16>, vector<64x64xf32> -> vector<64x64xf32>
    %177 = arith.addf %176, %23 : vector<64x64xf32>
    %cst_47 = arith.constant dense<0xFF800000> : vector<64xf32>
    %178 = vector.multi_reduction <maximumf>, %177, %cst_47 [1] : vector<64x64xf32> to vector<64xf32>
    %179 = vector.shape_cast %178 : vector<64xf32> to vector<64x1xf32>
    %180 = vector.broadcast %179 : vector<64x1xf32> to vector<64x64xf32>
    %181 = arith.subf %177, %180 : vector<64x64xf32>
    %182 = math.exp %181 : vector<64x64xf32>
    %cst_48 = arith.constant dense<0.000000e+00> : vector<64xf32>
    %183 = vector.multi_reduction <add>, %182, %cst_48 [1] : vector<64x64xf32> to vector<64xf32>
    %184 = vector.shape_cast %183 : vector<64xf32> to vector<64x1xf32>
    %185 = tpu.reciprocal %184 {approx = true} : vector<64x1xf32> -> vector<64x1xf32>
    %186 = vector.broadcast %185 : vector<64x1xf32> to vector<64x64xf32>
    %187 = arith.mulf %182, %186 : vector<64x64xf32>
    %188 = arith.truncf %187 : vector<64x64xf32> to vector<64x64xbf16>
    %189 = arith.truncf %173 : vector<64x8xf32> to vector<64x8xbf16>
    %cst_49 = arith.constant dense<0.000000e+00> : vector<64x8xf32>
    %190 = tpu.matmul %188, %189, %cst_49 {dimension_numbers = #tpu.dot_dimension_numbers<[1], [0], [0], [1], [0, 0, 1, 1], [], []>} : vector<64x64xbf16>, vector<64x8xbf16>, vector<64x8xf32> -> vector<64x8xf32>
    %191 = vector.extract_strided_slice %190 {offsets = [0, 0], sizes = [16, 8], strides = [1, 1]} : vector<64x8xf32> to vector<16x8xf32>
    %192 = vector.extract_strided_slice %190 {offsets = [16, 0], sizes = [16, 8], strides = [1, 1]} : vector<64x8xf32> to vector<16x8xf32>
    %193 = vector.extract_strided_slice %190 {offsets = [32, 0], sizes = [16, 8], strides = [1, 1]} : vector<64x8xf32> to vector<16x8xf32>
    %194 = vector.extract_strided_slice %190 {offsets = [48, 0], sizes = [16, 8], strides = [1, 1]} : vector<64x8xf32> to vector<16x8xf32>
    %195 = tpu.concatenate %191, %192, %193, %194 in 1 : vector<16x8xf32>, vector<16x8xf32>, vector<16x8xf32>, vector<16x8xf32> -> vector<16x32xf32>
    %196 = arith.truncf %195 : vector<16x32xf32> to vector<16x32xbf16>
    %cst_50 = arith.constant dense<0.000000e+00> : vector<16x32xf32>
    %197 = tpu.matmul %196, %141, %cst_50 {dimension_numbers = #tpu.dot_dimension_numbers<[1], [0], [0], [1], [0, 0, 1, 1], [], []>} : vector<16x32xbf16>, vector<32x32xbf16>, vector<16x32xf32> -> vector<16x32xf32>
    %198 = vector.broadcast %149 : vector<1x32xf32> to vector<16x32xf32>
    %199 = arith.addf %197, %198 : vector<16x32xf32>
    %200 = arith.addf %137, %199 : vector<16x32xf32>
    %cst_51 = arith.constant dense<0.000000e+00> : vector<16xf32>
    %201 = vector.multi_reduction <add>, %200, %cst_51 [1] : vector<16x32xf32> to vector<16xf32>
    %202 = vector.shape_cast %201 : vector<16xf32> to vector<16x1xf32>
    %cst_52 = arith.constant 3.125000e-02 : f32
    %203 = vector.broadcast %cst_52 : f32 to vector<16x1xf32>
    %204 = arith.mulf %202, %203 : vector<16x1xf32>
    %205 = vector.broadcast %204 : vector<16x1xf32> to vector<16x32xf32>
    %206 = arith.subf %200, %205 : vector<16x32xf32>
    %207 = arith.mulf %206, %206 : vector<16x32xf32>
    %cst_53 = arith.constant dense<0.000000e+00> : vector<16xf32>
    %208 = vector.multi_reduction <add>, %207, %cst_53 [1] : vector<16x32xf32> to vector<16xf32>
    %209 = vector.shape_cast %208 : vector<16xf32> to vector<16x1xf32>
    %cst_54 = arith.constant 3.125000e-02 : f32
    %210 = vector.broadcast %cst_54 : f32 to vector<16x1xf32>
    %211 = arith.mulf %209, %210 : vector<16x1xf32>
    %cst_55 = arith.constant 9.99999974E-6 : f32
    %212 = vector.broadcast %cst_55 : f32 to vector<16x1xf32>
    %213 = arith.addf %211, %212 : vector<16x1xf32>
    %214 = math.rsqrt %213 : vector<16x1xf32>
    %215 = vector.broadcast %214 : vector<16x1xf32> to vector<16x32xf32>
    %216 = arith.mulf %206, %215 : vector<16x32xf32>
    %217 = vector.broadcast %150 : vector<1x32xf32> to vector<16x32xf32>
    %218 = arith.mulf %216, %217 : vector<16x32xf32>
    %219 = vector.broadcast %151 : vector<1x32xf32> to vector<16x32xf32>
    %220 = arith.addf %218, %219 : vector<16x32xf32>
    %221 = arith.truncf %220 : vector<16x32xf32> to vector<16x32xbf16>
    %cst_56 = arith.constant dense<0.000000e+00> : vector<16x64xf32>
    %222 = tpu.matmul %221, %142, %cst_56 {dimension_numbers = #tpu.dot_dimension_numbers<[1], [0], [0], [1], [0, 0, 1, 1], [], []>} : vector<16x32xbf16>, vector<32x64xbf16>, vector<16x64xf32> -> vector<16x64xf32>
    %223 = vector.broadcast %148 : vector<1x64xf32> to vector<16x64xf32>
    %224 = arith.addf %222, %223 : vector<16x64xf32>
    %cst_57 = arith.constant 0.000000e+00 : f32
    %225 = vector.broadcast %cst_57 : f32 to vector<16x64xf32>
    %226 = arith.maximumf %224, %225 : vector<16x64xf32>
    %227 = arith.truncf %226 : vector<16x64xf32> to vector<16x64xbf16>
    %cst_58 = arith.constant dense<0.000000e+00> : vector<16x32xf32>
    %228 = tpu.matmul %227, %144, %cst_58 {dimension_numbers = #tpu.dot_dimension_numbers<[1], [0], [0], [1], [0, 0, 1, 1], [], []>} : vector<16x64xbf16>, vector<64x32xbf16>, vector<16x32xf32> -> vector<16x32xf32>
    %229 = vector.broadcast %152 : vector<1x32xf32> to vector<16x32xf32>
    %230 = arith.addf %228, %229 : vector<16x32xf32>
    %231 = arith.addf %220, %230 : vector<16x32xf32>
    %cst_59 = arith.constant dense<0.000000e+00> : vector<16xf32>
    %232 = vector.multi_reduction <add>, %231, %cst_59 [1] : vector<16x32xf32> to vector<16xf32>
    %233 = vector.shape_cast %232 : vector<16xf32> to vector<16x1xf32>
    %cst_60 = arith.constant 3.125000e-02 : f32
    %234 = vector.broadcast %cst_60 : f32 to vector<16x1xf32>
    %235 = arith.mulf %233, %234 : vector<16x1xf32>
    %236 = vector.broadcast %235 : vector<16x1xf32> to vector<16x32xf32>
    %237 = arith.subf %231, %236 : vector<16x32xf32>
    %238 = arith.mulf %237, %237 : vector<16x32xf32>
    %cst_61 = arith.constant dense<0.000000e+00> : vector<16xf32>
    %239 = vector.multi_reduction <add>, %238, %cst_61 [1] : vector<16x32xf32> to vector<16xf32>
    %240 = vector.shape_cast %239 : vector<16xf32> to vector<16x1xf32>
    %cst_62 = arith.constant 3.125000e-02 : f32
    %241 = vector.broadcast %cst_62 : f32 to vector<16x1xf32>
    %242 = arith.mulf %240, %241 : vector<16x1xf32>
    %cst_63 = arith.constant 9.99999974E-6 : f32
    %243 = vector.broadcast %cst_63 : f32 to vector<16x1xf32>
    %244 = arith.addf %242, %243 : vector<16x1xf32>
    %245 = math.rsqrt %244 : vector<16x1xf32>
    %246 = vector.broadcast %245 : vector<16x1xf32> to vector<16x32xf32>
    %247 = arith.mulf %237, %246 : vector<16x32xf32>
    %248 = vector.broadcast %153 : vector<1x32xf32> to vector<16x32xf32>
    %249 = arith.mulf %247, %248 : vector<16x32xf32>
    %250 = vector.broadcast %154 : vector<1x32xf32> to vector<16x32xf32>
    %251 = arith.addf %249, %250 : vector<16x32xf32>
    %252 = arith.truncf %251 : vector<16x32xf32> to vector<16x32xbf16>
    %cst_64 = arith.constant dense<0.000000e+00> : vector<16x32xf32>
    %253 = tpu.matmul %252, %3, %cst_64 {dimension_numbers = #tpu.dot_dimension_numbers<[1], [0], [0], [1], [0, 0, 1, 1], [], []>} : vector<16x32xbf16>, vector<32x32xbf16>, vector<16x32xf32> -> vector<16x32xf32>
    %254 = vector.broadcast %8 : vector<1x32xf32> to vector<16x32xf32>
    %255 = arith.addf %253, %254 : vector<16x32xf32>
    %cst_65 = arith.constant 0.000000e+00 : f32
    %256 = vector.broadcast %cst_65 : f32 to vector<16x32xf32>
    %257 = arith.maximumf %255, %256 : vector<16x32xf32>
    %258 = arith.truncf %257 : vector<16x32xf32> to vector<16x32xbf16>
    %cst_66 = arith.constant dense<0.000000e+00> : vector<16x32xf32>
    %259 = tpu.matmul %258, %4, %cst_66 {dimension_numbers = #tpu.dot_dimension_numbers<[1], [0], [0], [1], [0, 0, 1, 1], [], []>} : vector<16x32xbf16>, vector<32x32xbf16>, vector<16x32xf32> -> vector<16x32xf32>
    %260 = vector.broadcast %9 : vector<1x32xf32> to vector<16x32xf32>
    %261 = arith.addf %259, %260 : vector<16x32xf32>
    %cst_67 = arith.constant 0.000000e+00 : f32
    %262 = vector.broadcast %cst_67 : f32 to vector<16x32xf32>
    %263 = arith.maximumf %261, %262 : vector<16x32xf32>
    %264 = vector.extract_strided_slice %263 {offsets = [0, 0], sizes = [8, 3], strides = [1, 1]} : vector<16x32xf32> to vector<8x3xf32>
    %cst_68 = arith.constant dense<0xFF800000> : vector<3xf32>
    %265 = vector.multi_reduction <maximumf>, %264, %cst_68 [0] : vector<8x3xf32> to vector<3xf32>
    %266 = vector.shape_cast %265 : vector<3xf32> to vector<1x3xf32>
    %267 = vector.broadcast %266 : vector<1x3xf32> to vector<8x3xf32>
    %268 = arith.subf %264, %267 : vector<8x3xf32>
    %269 = math.exp %268 : vector<8x3xf32>
    %cst_69 = arith.constant dense<0.000000e+00> : vector<3xf32>
    %270 = vector.multi_reduction <add>, %269, %cst_69 [0] : vector<8x3xf32> to vector<3xf32>
    %271 = vector.shape_cast %270 : vector<3xf32> to vector<1x3xf32>
    %272 = vector.extract_strided_slice %269 {offsets = [7, 0], sizes = [1, 3], strides = [1, 1]} : vector<8x3xf32> to vector<1x3xf32>
    %273 = arith.divf %272, %271 : vector<1x3xf32>
    %274 = vector.extract_strided_slice %263 {offsets = [8, 0], sizes = [8, 3], strides = [1, 1]} : vector<16x32xf32> to vector<8x3xf32>
    %cst_70 = arith.constant dense<0xFF800000> : vector<3xf32>
    %275 = vector.multi_reduction <maximumf>, %274, %cst_70 [0] : vector<8x3xf32> to vector<3xf32>
    %276 = vector.shape_cast %275 : vector<3xf32> to vector<1x3xf32>
    %277 = vector.broadcast %276 : vector<1x3xf32> to vector<8x3xf32>
    %278 = arith.subf %274, %277 : vector<8x3xf32>
    %279 = math.exp %278 : vector<8x3xf32>
    %cst_71 = arith.constant dense<0.000000e+00> : vector<3xf32>
    %280 = vector.multi_reduction <add>, %279, %cst_71 [0] : vector<8x3xf32> to vector<3xf32>
    %281 = vector.shape_cast %280 : vector<3xf32> to vector<1x3xf32>
    %282 = vector.extract_strided_slice %279 {offsets = [7, 0], sizes = [1, 3], strides = [1, 1]} : vector<8x3xf32> to vector<1x3xf32>
    %283 = arith.divf %282, %281 : vector<1x3xf32>
    %284 = tpu.concatenate %273, %283 in 0 : vector<1x3xf32>, vector<1x3xf32> -> vector<2x3xf32>
    %c0_72 = arith.constant 0 : index
    %c0_73 = arith.constant 0 : index
    %285 = vector.load %arg8[%c0_72, %c0_73] : memref<2x3xf32, #tpu.memory_space<vmem>>, vector<2x3xf32>
    tpu.vector_store %arg8[%c0_72, %c0_73], %284 {strides = array<i32>} : memref<2x3xf32, #tpu.memory_space<vmem>>, vector<2x3xf32>,
    return
  }
  func.func @transform_0(%arg0: i32) -> (i32, i32) {
    %c0_i32 = arith.constant 0 : i32
    %c0_i32_0 = arith.constant 0 : i32
    %c0_i32_1 = arith.constant 0 : i32
    return %c0_i32, %c0_i32_0 : i32, i32
  }
  func.func @transform_1(%arg0: i32) -> (i32, i32) {
    %c0_i32 = arith.constant 0 : i32
    %c0_i32_0 = arith.constant 0 : i32
    %c0_i32_1 = arith.constant 0 : i32
    return %c0_i32, %c0_i32_0 : i32, i32
  }
  func.func @transform_2(%arg0: i32) -> (i32, i32) {
    %c0_i32 = arith.constant 0 : i32
    %c0_i32_0 = arith.constant 0 : i32
    %c0_i32_1 = arith.constant 0 : i32
    return %c0_i32, %c0_i32_0 : i32, i32
  }
  func.func @transform_3(%arg0: i32) -> (i32, i32) {
    %c0_i32 = arith.constant 0 : i32
    %c0_i32_0 = arith.constant 0 : i32
    %c0_i32_1 = arith.constant 0 : i32
    return %c0_i32, %c0_i32_0 : i32, i32
  }
  func.func @transform_4(%arg0: i32) -> (i32, i32, i32) {
    %c0_i32 = arith.constant 0 : i32
    %c0_i32_0 = arith.constant 0 : i32
    %c0_i32_1 = arith.constant 0 : i32
    %c0_i32_2 = arith.constant 0 : i32
    return %c0_i32, %c0_i32_0, %c0_i32_1 : i32, i32, i32
  }
  func.func @transform_5(%arg0: i32) -> (i32, i32, i32) {
    %c0_i32 = arith.constant 0 : i32
    %c0_i32_0 = arith.constant 0 : i32
    %c0_i32_1 = arith.constant 0 : i32
    %c0_i32_2 = arith.constant 0 : i32
    return %c0_i32, %c0_i32_0, %c0_i32_1 : i32, i32, i32
  }
  func.func @transform_6(%arg0: i32) -> (i32, i32, i32) {
    %c0_i32 = arith.constant 0 : i32
    %c0_i32_0 = arith.constant 0 : i32
    %c0_i32_1 = arith.constant 0 : i32
    %c0_i32_2 = arith.constant 0 : i32
    return %c0_i32, %c0_i32_0, %c0_i32_1 : i32, i32, i32
  }
  func.func @transform_7(%arg0: i32) -> (i32, i32) {
    %c0_i32 = arith.constant 0 : i32
    %c0_i32_0 = arith.constant 0 : i32
    %c0_i32_1 = arith.constant 0 : i32
    return %c0_i32, %c0_i32_0 : i32, i32
  }
}

</mosaic_0001>

<bundles_post_ra>
// kernel: attention_transformer_forward.1
= control target key start
LH: loop header
LB: loop body
LE: loop exit
PB: predicated region body
PF: predicated region fallthrough
CT: control target
= control target key end

     0   :  { %v2256_v1 = vmov 0.0   ;;  %vm2257_vm0 = vmmov 0   ;;  %vm58_vm1 = vcmask 130048   ;;  %s2779_s0 = inlined_call_operand.vmem [shape: f32[16,16], index: 0, kind: input, shape index: {}]   ;;  %s2780_s1 = inlined_call_operand.vmem [shape: bf16[112,32], index: 1, kind: input, shape index: {}]   ;;  %s2781_s2 = inlined_call_operand.vmem [shape: f32[20,32], index: 2, kind: input, shape index: {}]   ;;  %s2782_s3 = inlined_call_operand.vmem [shape: f32[64,64], index: 3, kind: input, shape index: {}]   ;;  %s2783_s4 = inlined_call_operand.vmem [shape: bf16[2,32,192], index: 4, kind: input, shape index: {}]   ;;  %s2784_s5 = inlined_call_operand.vmem [shape: bf16[2,64,32], index: 5, kind: input, shape index: {}]   ;;  %s2785_s6 = inlined_call_operand.vmem [shape: f32[2,8,96], index: 6, kind: input, shape index: {}]   ;;  %s2786_s7 = inlined_call_operand.hbm [shape: f32[2,3], index: 7, kind: output, shape index: {}]  }
   0x1   :  { %v2118_v0 = vld [vmem:[%s2780_s1] sm:$0xff]   ;;  %1872 = vmatprep.subr.bf16.mxu0 %v2256_v1  ;;  %v46_v3 = vld [vmem:[%s2779_s0 + $0x8] sm:$0xff]  ;;  %1878 = vmatprep.subr.bf16.mxu1 %v2256_v1 }
   0x2   :  { %v45_v2 = vld [vmem:[%s2779_s0] sm:$0xff]  ;;  %1873 = vmatpush3.bf16.msra.mxu0 %v2118_v0  ;;  %1874 = vmatprep.mubr.msk.bf16.mxu0 %vm2257_vm0, %v2256_v1 }
   0x3   :  { %v47_v4 = vpack.c.bf16 %v46_v3, %v45_v2  ;;  %1882 = vmatprep.mubr.msk.bf16.mxu1 %vm2257_vm0, %v2256_v1  ;;  %1886 = vmatprep.subr.bf16.mxu0 %v2256_v1 }
   0x5   :  { %1875 = vmatmul.mubr.msk.bf16.vlgmr.msra.gmra.mxu0 %vm58_vm1, %v47_v4 }
   0x6   :  { %1890 = vmatprep.mubr.msk.bf16.mxu0 %vm2257_vm0, %v2256_v1 }
   0x7   :  { %12 = vsyncpa [#allocation3], 0  ;;  %v2119_v5 = vld [vmem:[%s2780_s1 + $0x10] sm:$0xff]   ;;  %v2120_v6 = vld [vmem:[%s2780_s1 + $0x8] sm:$0xff]   ;;  %v48_v7 = vlaneseq  ;;  %vm122_vm2 = vcmask 261120   ;;  %vm170_vm3 = vcmask 1043456  }
   0x8   :  { %1879 = vmatpush3.bf16.msra.mxu1 %v2119_v5  ;;  %v42_v10 = vld [vmem:[%s2781_s2] sm:$0xff]  ;;  %v2347_v21 = vld [vmem:[%s2783_s4 + $0x10] ss:$8 sps:$4 sm:$0xff]   ;;  %v43_v24 = vld [vmem:[%s2781_s2 + $0x8] sm:$0xff]  ;;  %vm298_vm4 = vcmask 64512   ;;  %s2258_s22 = smov 120  }
   0x9   :  { %1880 = vmatprep.subr.bf16.mxu1 %v2256_v1  ;;  %v2334_v8 = vshrl.u32 %v48_v7, 7  ;;  %1887 = vmatpush3.bf16.msra.mxu0 %v2347_v21  ;;  %v2354_v22 = vld [vmem:[%s2783_s4] ss:$8 sps:$4 sm:$0xff]   ;;  %v44_v25 = vld [vmem:[%s2781_s2 + $0x10] sm:$0xf]  ;;  %v171_v28 = vrot.slane %v42_v10, 4 }
   0xa   :  { %1888 = vmatprep.subr.bf16.mxu0 %v2256_v1  ;;  %v172_v29 = vrot.slane %v43_v24, 4  ;;  %v174_v30 = vrot.slane %v44_v25, 4  ;;  %v2377_v41 = vld [vmem:[%s2785_s6] sm:$0xff]  ;;  %s2259_s23 = smov 104   ;;  %s2260_s24 = smov 112   ;;  %vm388_vm5 = vcmask 523264  }
   0xb   :  { %v2337_v9 = vsub.s32 0, %v2334_v8  ;;  %v2358_v23 = vsub.s32 1, %v2334_v8  ;;  %s2261_s25 = smov 96   ;;  %s2263_s18 = smov 32   ;;  %vm598_vm6 = vcmask 195584   ;;  %vm1674_vm7 = vcmask 23552  }
   0xc   :  { %1881 = vmatpush3.bf16.msra.mxu1 %v2120_v6  ;;  %v173_v33 = vsel %vm170_vm3, %v171_v28, %v172_v29  ;;  %v175_v35 = vsel %vm170_vm3, %v172_v29, %v174_v30  ;;  %v2449_v30 = vld [vmem:[%s2782_s3 + $0x20] sm:$0xff]  ;;  %s2264_s19 = smov 8   ;;  %s2265_s20 = smov 24   ;;  %vm1719_vm8 = vcmask 1040384   ;;  %vm1721_vm9 = vcmask 17408  }
   0xd   :  { %v51_v11 = vrot.slane %v42_v10, %v2337_v9  ;;  %1889 = vmatpush3.bf16.msra.mxu0 %v2354_v22  ;;  %v109_v26 = vrot.slane %v42_v10, %v2358_v23  ;;  %v205_v43 = vrot.slane %v2377_v41, %v2337_v9  ;;  %s2266_s21 = smov 16  }
  0xc5   :  { %v96_v12 = vpop.f32.mrf.mxu0 }
  0xc6   :  { %v97_v14 = vadd.f32 %v96_v12, %v51_v11 }
  0xc7   :  { %v1876_v13 = vpop.f32.mrf.mxu0 }
  0xc8   :  { %v103_v18 = vmax.f32 %v97_v14, 0.0  ;;  %v2427_v13 = vld [vmem:[%s2782_s3 + $0x18] sm:$0xff] }
  0xc9   :  { %v99_v15 = vpop.f32.mrf.mxu0 }
  0xca   :  { %v100_v16 = vadd.f32 %v99_v15, %v51_v11  ;;  %v2422_v11 = vld [vmem:[%s2782_s3] sm:$0xff] }
  0xcb   :  { %v1877_v17 = vpop.f32.mrf.mxu0 }
  0xcc   :  { %v104_v19 = vmax.f32 %v100_v16, 0.0  ;;  %v2433_v16 = vld [vmem:[%s2782_s3 + $0x8] sm:$0xff] }
  0xce   :  { %v105_v20 = vpack.c.bf16 %v104_v19, %v103_v18  ;;  %v2440_v19 = vld [vmem:[%s2782_s3 + $0x10] sm:$0xff] }
  0xd0   :  { %1883 = vmatmul.mubr.msk.bf16.vlgmr.msra.gmra.mxu1 %vm122_vm2, %v105_v20 }
 0x190   :  { %v160_v27 = vpop.f32.mrf.mxu1 }
 0x191   :  { %v161_v32 = vadd.f32 %v160_v27, %v109_v26 }
 0x192   :  { %v1884_v31 = vpop.f32.mrf.mxu1 }
 0x193   :  { %v2367_v38 = vadd.f32 %v173_v33, %v161_v32  ;;  %v2454_v32 = vld [vmem:[%s2782_s3 + $0x28] sm:$0xff] }
 0x194   :  { %v163_v34 = vpop.f32.mrf.mxu1 }
 0x195   :  { %v164_v36 = vadd.f32 %v163_v34, %v109_v26 }
 0x196   :  { %v1885_v37 = vpop.f32.mrf.mxu1 }
 0x197   :  { %v2369_v39 = vadd.f32 %v175_v35, %v164_v36  ;;  %v2461_v35 = vld [vmem:[%s2782_s3 + $0x30] sm:$0xff]  ;;  %v2466_v36 = vld [vmem:[%s2782_s3 + $0x38] sm:$0xff]  ;;  %s2262_s3 = smov 64  }
 0x199   :  { %v201_v40 = vpack.c.bf16 %v2369_v39, %v2367_v38 }
 0x19b   :  { %1891 = vmatmul.mubr.msk.bf16.vlgmr.msra.gmra.mxu0 %vm122_vm2, %v201_v40 }
 0x25b   :  { %v255_v42 = vpop.f32.mrf.mxu0 }
 0x25c   :  { %v256_v46 = vadd.f32 %v255_v42, %v205_v43 }
 0x25d   :  { %v1892_v44 = vpop.f32.mrf.mxu0 }
 0x25f   :  { %v258_v45 = vpop.f32.mrf.mxu0 }
 0x260   :  { %v259_v47 = vadd.f32 %v258_v45, %v205_v43 }
 0x261   :  { %v1893_v48 = vpop.f32.mrf.mxu0 }
 0x262   :  { %v2068_v49 = vpack.i.bf16 %v259_v47, %v256_v46  ;;  %v2381_v50 = vpack.c.bf16 %v259_v47, %v256_v46 }
 0x264   :  { %2069 = vrot.lane.b32.xlu1 %v2068_v49, %s2258_s22  ;;  %2059 = vrot.lane.b32.xlu0 %v2068_v49, %s2259_s23 }
 0x265   :  { %1902 = vmatprep.mubr.msk.bf16.mxu1 %vm298_vm4, %v2381_v50 }
 0x268   :  { %2064 = vrot.lane.b32.xlu0 %v2068_v49, %s2260_s24 }
 0x2d6   :  { %v2070_v51 = vpop.permute.xlu1 %2069  ;;  %v2060_v52 = vpop.permute.xlu0 %2059 }
 0x2d7   :  { %v2062_v53 = vunpack.i.h.bf16 %v2060_v52  ;;  %v2061_v54 = vunpack.i.l.bf16 %v2060_v52  ;;  %v2072_v55 = vunpack.i.h.bf16 %v2070_v51  ;;  %v2071_v56 = vunpack.i.l.bf16 %v2070_v51 }
 0x2d9   :  { %v2388_v57 = vpack.c.bf16 %v2062_v53, %v2061_v54  ;;  %v2392_v61 = vpack.c.bf16 %v2072_v55, %v2071_v56 }
 0x2da   :  { %v2065_v58 = vpop.permute.xlu0 %2064 }
 0x2db   :  { %v2067_v59 = vunpack.i.h.bf16 %v2065_v58  ;;  %v2066_v60 = vunpack.i.l.bf16 %v2065_v58  ;;  %296 = vrot.lane.b32.xlu1 %v2388_v57, %s2261_s25 }
 0x2dd   :  { %v2394_v62 = vpack.c.bf16 %v2067_v59, %v2066_v60 }
 0x2df   :  { %294 = vrot.lane.b32.xlu0 %v2394_v62, %s2261_s25  ;;  %292 = vrot.lane.b32.xlu1 %v2392_v61, %s2261_s25 }
 0x2e3   :  { %290 = vrot.lane.b32.xlu0 %v2381_v50, %s2261_s25 }
 0x34d   :  { %v297_v63 = vpop.permute.xlu1 %296 }
 0x34e   :  { %v321_v0 = vsel %vm298_vm4, %v297_v63, 0  ;;  %2038 = vmatprep.subr.msk.bf16.mxu1 %vm298_vm4, %v297_v63 }
 0x34f   :  { %1895 = vmatpush3.bf16.xpose.msra.mxu1 %v321_v0 }
 0x351   :  { %v295_v2 = vpop.permute.xlu0 %294  ;;  %v293_v4 = vpop.permute.xlu1 %292 }
 0x352   :  { %2039 = vmatprep.subr.msk.bf16.mxu1 %vm298_vm4, %v295_v2  ;;  %v318_v3 = vsel %vm298_vm4, %v295_v2, 0  ;;  %v315_v5 = vsel %vm298_vm4, %v293_v4, 0 }
 0x355   :  { %v291_v6 = vpop.permute.xlu0 %290 }
 0x356   :  { %v312_v7 = vsel %vm298_vm4, %v291_v6, 0 }
 0x357   :  { %1897 = vmatpush3.bf16.xpose.msra.mxu1 %v318_v3 }
 0x358   :  { %2040 = vmatprep.subr.msk.bf16.mxu1 %vm298_vm4, %v293_v4 }
 0x35f   :  { %1899 = vmatpush3.bf16.xpose.msra.mxu1 %v315_v5 }
 0x360   :  { %2041 = vmatprep.subr.msk.bf16.mxu1 %vm298_vm4, %v291_v6 }
 0x367   :  { %1901 = vmatpush3.bf16.xpose.msra.mxu1 %v312_v7 }
 0x368   :  { %1942 = vmatprep.subr.bf16.mxu1 %v2256_v1 }
 0x36e   :  { %1903 = vmatmul.mubr.msk.bf16.vlgmr.msra.gmra.mxu1 %vm298_vm4, %v2392_v61 }
 0x36f   :  { %1906 = vmatprep.mubr.msk.bf16.mxu1 %vm298_vm4, %v2394_v62 }
 0x376   :  { %1907 = vmatmul.mubr.msk.bf16.gmra.mxu1 %vm298_vm4, %v2388_v57 }
 0x377   :  { %1950 = vmatprep.mubr.msk.bf16.mxu1 %vm2257_vm0, %v2256_v1 }
 0x42e   :  { %v1904_v10 = vpop.f32.mrf.mxu1 }
 0x42f   :  { %v366_v26 = vadd.f32 %v1904_v10, %v2440_v19 }
 0x430   :  { %v357_v12 = vpop.f32.mrf.mxu1 }
 0x431   :  { %v358_v14 = vadd.f32 %v357_v12, %v2422_v11  ;;  %v395_v34 = vsel %vm388_vm5, %v366_v26, -inf }
 0x432   :  { %v1905_v15 = vpop.f32.mrf.mxu1 }
 0x433   :  { %v369_v17 = vadd.f32 %v1905_v15, %v2427_v13  ;;  %v389_v18 = vsel %vm388_vm5, %v358_v14, -inf }
 0x434   :  { %v360_v20 = vpop.f32.mrf.mxu1  ;;  %390 = vmax.xlane.f32.xlu1 %v389_v18 }
 0x435   :  { %v361_v24 = vadd.f32 %v360_v20, %v2433_v16  ;;  %v398_v28 = vsel %vm388_vm5, %v369_v17, -inf }
 0x436   :  { %v1908_v25 = vpop.f32.mrf.mxu1 }
 0x437   :  { %v392_v27 = vsel %vm388_vm5, %v361_v24, -inf  ;;  %v382_v42 = vadd.f32 %v1908_v25, %v2461_v35 }
 0x438   :  { %v373_v29 = vpop.f32.mrf.mxu1  ;;  %393 = vmax.xlane.f32.xlu0 %v392_v27  ;;  %399 = vmax.xlane.f32.xlu1 %v398_v28 }
 0x439   :  { %v374_v33 = vadd.f32 %v373_v29, %v2449_v30  ;;  %v407_v46 = vsel %vm388_vm5, %v382_v42, -inf }
 0x43a   :  { %v1909_v31 = vpop.f32.mrf.mxu1 }
 0x43b   :  { %v385_v43 = vadd.f32 %v1909_v31, %v2466_v36  ;;  %v401_v44 = vsel %vm388_vm5, %v374_v33, -inf }
 0x43c   :  { %v376_v37 = vpop.f32.mrf.mxu1  ;;  %396 = vmax.xlane.f32.xlu0 %v395_v34 }
 0x43d   :  { %v377_v40 = vadd.f32 %v376_v37, %v2454_v32  ;;  %v410_v47 = vsel %vm388_vm5, %v385_v43, -inf }
 0x43f   :  { %v404_v45 = vsel %vm388_vm5, %v377_v40, -inf }
 0x440   :  { %402 = vmax.xlane.f32.xlu0 %v401_v44  ;;  %405 = vmax.xlane.f32.xlu1 %v404_v45 }
 0x444   :  { %408 = vmax.xlane.f32.xlu0 %v407_v46  ;;  %411 = vmax.xlane.f32.xlu1 %v410_v47 }
 0x455   :  { %485 = vrot.lane.b32.xlu1 %v2394_v62, %s2262_s3 }
 0x45a   :  { %487 = vrot.lane.b32.xlu0 %v2388_v57, %s2262_s3 }
 0x4bd   :  { %v391_v48 = vpop.xlane.xlu1 %390 }
 0x4be   :  { %v413_v54 = vsub.f32 %v358_v14, %v391_v48 }
 0x4c0   :  { %v421_v60 = vmul.f32 1.442695, %v413_v54 }
 0x4c1   :  { %v394_v49 = vpop.xlane.xlu0 %393  ;;  %v400_v51 = vpop.xlane.xlu1 %399 }
 0x4c2   :  { %v414_v52 = vsub.f32 %v361_v24, %v394_v49  ;;  %v416_v53 = vsub.f32 %v369_v17, %v400_v51 }
 0x4c4   :  { %v427_v55 = vmul.f32 1.442695, %v416_v53  ;;  %v423_v56 = vmul.f32 1.442695, %v414_v52 }
 0x4c5   :  { %v397_v58 = vpop.xlane.xlu0 %396 }
 0x4c6   :  { %v415_v59 = vsub.f32 %v366_v26, %v397_v58  ;;  %2145 = vpow2.f32 %v427_v55 }
 0x4c7   :  { %2147 = vpow2.f32 %v423_v56 }
 0x4c8   :  { %v425_v63 = vmul.f32 1.442695, %v415_v59 }
 0x4c9   :  { %v403_v0 = vpop.xlane.xlu0 %402  ;;  %v406_v2 = vpop.xlane.xlu1 %405 }
 0x4ca   :  { %2149 = vpow2.f32 %v425_v63  ;;  %v417_v62 = vsub.f32 %v374_v33, %v403_v0  ;;  %v418_v57 = vsub.f32 %v377_v40, %v406_v2 }
 0x4cb   :  { %2151 = vpow2.f32 %v421_v60 }
 0x4cc   :  { %v429_v7 = vmul.f32 1.442695, %v417_v62  ;;  %v431_v14 = vmul.f32 1.442695, %v418_v57 }
 0x4cd   :  { %v409_v3 = vpop.xlane.xlu0 %408  ;;  %v412_v4 = vpop.xlane.xlu1 %411 }
 0x4ce   :  { %v419_v5 = vsub.f32 %v382_v42, %v409_v3  ;;  %v420_v6 = vsub.f32 %v385_v43, %v412_v4 }
 0x4d0   :  { %v433_v10 = vmul.f32 1.442695, %v419_v5  ;;  %v435_v12 = vmul.f32 1.442695, %v420_v6 }
 0x4d1   :  { %v488_v15 = vpop.permute.xlu0 %487  ;;  %v486_v17 = vpop.permute.xlu1 %485 }
 0x4d2   :  { %2153 = vpow2.f32 %v433_v10  ;;  %1910 = vmatprep.subr.bf16.mxu0 %v488_v15 }
 0x4d3   :  { %2155 = vpow2.f32 %v435_v12  ;;  %1911 = vmatpush3.bf16.msra.mxu0 %v488_v15  ;;  %v2146_v18 = vpop.eup %2145 }
 0x4d4   :  { %2157 = vpow2.f32 %v429_v7  ;;  %1912 = vmatprep.subr.bf16.mxu0 %v486_v17  ;;  %v446_v20 = vsel %vm388_vm5, %v2146_v18, 0.0  ;;  %v2148_v24 = vpop.eup %2147 }
 0x4d5   :  { %2159 = vpow2.f32 %v431_v14  ;;  %447 = vadd.xlane.f32.xlu1 %v446_v20  ;;  %v440_v28 = vsel %vm388_vm5, %v2148_v24, 0.0 }
 0x4d7   :  { %v2150_v25 = vpop.eup %2149  ;;  %1913 = vmatpush3.bf16.msra.mxu0 %v486_v17 }
 0x4d8   :  { %v443_v26 = vsel %vm388_vm5, %v2150_v25, 0.0  ;;  %v2152_v27 = vpop.eup %2151 }
 0x4d9   :  { %444 = vadd.xlane.f32.xlu0 %v443_v26  ;;  %441 = vadd.xlane.f32.xlu1 %v440_v28  ;;  %v437_v29 = vsel %vm388_vm5, %v2152_v27, 0.0 }
 0x4dd   :  { %438 = vadd.xlane.f32.xlu0 %v437_v29 }
 0x4df   :  { %v2154_v31 = vpop.eup %2153 }
 0x4e0   :  { %v2156_v33 = vpop.eup %2155  ;;  %v455_v34 = vsel %vm388_vm5, %v2154_v31, 0.0 }
 0x4e1   :  { %v2158_v37 = vpop.eup %2157  ;;  %456 = vadd.xlane.f32.xlu0 %v455_v34  ;;  %v458_v40 = vsel %vm388_vm5, %v2156_v33, 0.0 }
 0x4e2   :  { %v2160_v42 = vpop.eup %2159  ;;  %459 = vadd.xlane.f32.xlu1 %v458_v40  ;;  %v449_v43 = vsel %vm388_vm5, %v2158_v37, 0.0 }
 0x4e3   :  { %v452_v44 = vsel %vm388_vm5, %v2160_v42, 0.0 }
 0x4e5   :  { %450 = vadd.xlane.f32.xlu0 %v449_v43 }
 0x4e6   :  { %453 = vadd.xlane.f32.xlu1 %v452_v44 }
 0x4f7   :  { %483 = vrot.lane.b32.xlu1 %v2392_v61, %s2262_s3 }
 0x4fb   :  { %481 = vrot.lane.b32.xlu0 %v2381_v50, %s2262_s3  ;;  %608 = vrot.lane.b32.xlu1 %v2347_v21, %s2263_s18 }
 0x55e   :  { %v448_v45 = vpop.xlane.xlu1 %447 }
 0x562   :  { %v445_v46 = vpop.xlane.xlu0 %444  ;;  %v442_v47 = vpop.xlane.xlu1 %441 }
 0x563   :  { %2161 = vrcp.f32 %v442_v47 }
 0x564   :  { %2163 = vrcp.f32 %v445_v46 }
 0x566   :  { %v439_v48 = vpop.xlane.xlu0 %438 }
 0x567   :  { %2165 = vrcp.f32 %v439_v48 }
 0x568   :  { %2167 = vrcp.f32 %v448_v45 }
 0x56a   :  { %v457_v49 = vpop.xlane.xlu0 %456 }
 0x56b   :  { %v460_v51 = vpop.xlane.xlu1 %459  ;;  %2169 = vrcp.f32 %v457_v49 }
 0x56c   :  { %2171 = vrcp.f32 %v460_v51 }
 0x56e   :  { %v451_v52 = vpop.xlane.xlu0 %450 }
 0x56f   :  { %2173 = vrcp.f32 %v451_v52  ;;  %v454_v53 = vpop.xlane.xlu1 %453 }
 0x570   :  { %2175 = vrcp.f32 %v454_v53  ;;  %v2162_v61 = vpop.eup %2161 }
 0x571   :  { %v2164_v54 = vpop.eup %2163  ;;  %v470_v60 = vmul.f32 %v2162_v61, %v2148_v24 }
 0x572   :  { %v482_v58 = vpop.permute.xlu0 %481  ;;  %v471_v63 = vmul.f32 %v2164_v54, %v2150_v25 }
 0x573   :  { %v484_v55 = vpop.permute.xlu1 %483 }
 0x574   :  { %v2166_v50 = vpop.eup %2165  ;;  %1914 = vmatprep.subr.bf16.mxu0 %v484_v55 }
 0x575   :  { %v2168_v56 = vpop.eup %2167  ;;  %1915 = vmatpush3.bf16.msra.mxu0 %v484_v55  ;;  %v469_v59 = vmul.f32 %v2166_v50, %v2152_v27  ;;  %v2517_v55 = vsub.s32 2, %v2334_v8 }
 0x576   :  { %1916 = vmatprep.subr.bf16.mxu0 %v482_v58  ;;  %v472_v2 = vmul.f32 %v2168_v56, %v2146_v18 }
 0x577   :  { %v477_v0 = vpack.c.bf16 %v470_v60, %v469_v59  ;;  %v609_v17 = vpop.permute.xlu1 %608  ;;  %v605_v50 = vrot.slane %v2377_v41, %v2517_v55 }
 0x578   :  { %v2170_v62 = vpop.eup %2169  ;;  %v478_v57 = vpack.c.bf16 %v472_v2, %v471_v63 }
 0x579   :  { %1917 = vmatpush3.bf16.msra.mxu0 %v482_v58  ;;  %1918 = vmatprep.mubr.msk.bf16.mxu0 %vm388_vm5, %v477_v0  ;;  %v2172_v3 = vpop.eup %2171  ;;  %v475_v10 = vmul.f32 %v2170_v62, %v2154_v31 }
 0x57a   :  { %1926 = vmatprep.subr.bf16.mxu0 %v2256_v1  ;;  %v476_v12 = vmul.f32 %v2172_v3, %v2156_v33 }
 0x57c   :  { %v2174_v4 = vpop.eup %2173  ;;  %1919 = vmatmul.mubr.msk.bf16.vlgmr.msra.gmra.mxu0 %vm388_vm5, %v478_v57  ;;  %v480_v15 = vpack.c.bf16 %v476_v12, %v475_v10 }
 0x57d   :  { %v2176_v5 = vpop.eup %2175  ;;  %v473_v6 = vmul.f32 %v2174_v4, %v2158_v37  ;;  %1927 = vmatpush3.bf16.msra.mxu0 %v609_v17 }
 0x57e   :  { %v474_v7 = vmul.f32 %v2176_v5, %v2160_v42  ;;  %1928 = vmatprep.subr.bf16.mxu0 %v2256_v1 }
 0x580   :  { %v479_v14 = vpack.c.bf16 %v474_v7, %v473_v6 }
 0x582   :  { %1922 = vmatprep.mubr.msk.bf16.mxu0 %vm388_vm5, %v479_v14 }
 0x584   :  { %1923 = vmatmul.mubr.msk.bf16.gmra.mxu0 %vm388_vm5, %v480_v15 }
 0x585   :  { %1930 = vmatprep.mubr.msk.bf16.mxu0 %vm2257_vm0, %v2256_v1 }
 0x63c   :  { %v1920_v18 = vpop.f32.mrf.mxu0 }
 0x63e   :  { %v539_v20 = vpop.f32.mrf.mxu0 }
 0x640   :  { %v1921_v24 = vpop.f32.mrf.mxu0 }
 0x641   :  { %v2073_v25 = vpack.i.bf16 %v1921_v24, %v1920_v18  ;;  %v2126_v18 = vld [vmem:[%s2783_s4 + $0x4] ss:$8 sps:$4 sm:$0xff]  }
 0x642   :  { %v542_v26 = vpop.f32.mrf.mxu0 }
 0x643   :  { %2074 = vrot.lane.b32.xlu0 %v2073_v25, %s2264_s19 }
 0x644   :  { %v1924_v27 = vpop.f32.mrf.mxu0 }
 0x646   :  { %v555_v28 = vpop.f32.mrf.mxu0 }
 0x648   :  { %v1925_v29 = vpop.f32.mrf.mxu0 }
 0x649   :  { %v2078_v31 = vpack.i.bf16 %v1925_v29, %v1924_v27 }
 0x64a   :  { %v558_v33 = vpop.f32.mrf.mxu0 }
 0x64b   :  { %v2083_v34 = vpack.i.bf16 %v558_v33, %v555_v28  ;;  %2079 = vrot.lane.b32.xlu0 %v2078_v31, %s2265_s20  ;;  %v2540_v31 = vsub.s32 3, %v2334_v8 }
 0x64d   :  { %2084 = vrot.lane.b32.xlu1 %v2083_v34, %s2266_s21 }
 0x651   :  { %606 = vrot.lane.b32.xlu1 %v2354_v22, %s2263_s18 }
 0x6b5   :  { %v2075_v21 = vpop.permute.xlu0 %2074 }
 0x6b6   :  { %v2077_v37 = vunpack.i.h.bf16 %v2075_v21  ;;  %v2076_v40 = vunpack.i.l.bf16 %v2075_v21  ;;  %v687_v21 = vrot.slane %v2377_v41, %v2540_v31 }
 0x6b8   :  { %v594_v46 = vsel %vm298_vm4, %v539_v20, %v2076_v40  ;;  %v595_v47 = vsel %vm298_vm4, %v542_v26, %v2077_v37  ;;  %v2127_v20 = vld [vmem:[%s2784_s5 + $0x18] sm:$0xff]   ;;  %v692_v37 = vsub.s32 4, %v2334_v8 }
 0x6b9   :  { %1943 = vmatpush3.bf16.msra.mxu1 %v2127_v20 }
 0x6ba   :  { %1944 = vmatprep.subr.bf16.mxu1 %v2256_v1 }
 0x6bd   :  { %v2080_v42 = vpop.permute.xlu0 %2079 }
 0x6be   :  { %v2082_v48 = vunpack.i.h.bf16 %v2080_v42  ;;  %v2081_v49 = vunpack.i.l.bf16 %v2080_v42 }
 0x6bf   :  { %v2085_v43 = vpop.permute.xlu1 %2084 }
 0x6c0   :  { %v2087_v44 = vunpack.i.h.bf16 %v2085_v43  ;;  %v2086_v45 = vunpack.i.l.bf16 %v2085_v43 }
 0x6c2   :  { %v597_v51 = vsel %vm58_vm1, %v595_v47, %v2087_v44  ;;  %v596_v52 = vsel %vm58_vm1, %v594_v46, %v2086_v45  ;;  %v693_v44 = vrot.slane %v2377_v41, %v692_v37 }
 0x6c3   :  { %v600_v22 = vsel %vm598_vm6, %v597_v51, %v2082_v48  ;;  %v599_v53 = vsel %vm598_vm6, %v596_v52, %v2081_v49  ;;  %v607_v61 = vpop.permute.xlu1 %606  ;;  %v2128_v49 = vld [vmem:[%s2784_s5 + $0x10] sm:$0xff]   ;;  %v2129_v51 = vld [vmem:[%s2784_s5 + $0x8] sm:$0xff]   ;;  %v2130_v52 = vld [vmem:[%s2784_s5] sm:$0xff]  }
 0x6c4   :  { %v601_v54 = vpack.c.bf16 %v600_v22, %v599_v53  ;;  %1929 = vmatpush3.bf16.msra.mxu0 %v607_v61  ;;  %1945 = vmatpush3.bf16.msra.mxu1 %v2128_v49  ;;  %v700_v22 = vrot.slane %v2377_v41, %v2358_v23 }
 0x6c5   :  { %1934 = vmatprep.subr.bf16.mxu0 %v2256_v1  ;;  %1946 = vmatprep.subr.bf16.mxu1 %v2256_v1 }
 0x6c7   :  { %1931 = vmatmul.mubr.msk.bf16.vlgmr.msra.gmra.mxu0 %vm122_vm2, %v601_v54 }
 0x6c8   :  { %1938 = vmatprep.mubr.msk.bf16.mxu0 %vm2257_vm0, %v2256_v1  ;;  %1947 = vmatpush3.bf16.msra.mxu1 %v2129_v51 }
 0x6c9   :  { %1948 = vmatprep.subr.bf16.mxu1 %v2256_v1 }
 0x6cc   :  { %1949 = vmatpush3.bf16.msra.mxu1 %v2130_v52 }
 0x787   :  { %v649_v56 = vpop.f32.mrf.mxu0 }
 0x788   :  { %v650_v58 = vadd.f32 %v649_v56, %v605_v50 }
 0x789   :  { %v1932_v59 = vpop.f32.mrf.mxu0 }
 0x78a   :  { %v656_v60 = vadd.f32 %v650_v58, %v2367_v38 }
 0x78b   :  { %v652_v63 = vpop.f32.mrf.mxu0 }
 0x78c   :  { %v653_v0 = vadd.f32 %v652_v63, %v605_v50  ;;  %v658_v2 = vsel %vm122_vm2, %v656_v60, 0.0 }
 0x78d   :  { %659 = vadd.xlane.f32.xlu0 %v658_v2  ;;  %v1933_v62 = vpop.f32.mrf.mxu0 }
 0x78e   :  { %v657_v57 = vadd.f32 %v653_v0, %v2369_v39  ;;  %v2125_v39 = vld [vmem:[%s2783_s4 + $0x14] ss:$8 sps:$4 sm:$0xff]   ;;  %v758_v0 = vsub.s32 5, %v2334_v8 }
 0x78f   :  { %1935 = vmatpush3.bf16.msra.mxu0 %v2125_v39 }
 0x790   :  { %v661_v3 = vsel %vm122_vm2, %v657_v57, 0.0  ;;  %1936 = vmatprep.subr.bf16.mxu0 %v2256_v1  ;;  %v759_v2 = vrot.slane %v2377_v41, %v758_v0 }
 0x791   :  { %662 = vadd.xlane.f32.xlu1 %v661_v3 }
 0x793   :  { %1937 = vmatpush3.bf16.msra.mxu0 %v2126_v18 }
 0x794   :  { %1954 = vmatprep.subr.bf16.mxu0 %v2256_v1 }
 0x816   :  { %v660_v4 = vpop.xlane.xlu0 %659 }
 0x817   :  { %v664_v5 = vmul.f32 0.03125, %v660_v4 }
 0x819   :  { %v666_v6 = vsub.f32 %v656_v60, %v664_v5 }
 0x81a   :  { %v663_v7 = vpop.xlane.xlu1 %662 }
 0x81b   :  { %v665_v10 = vmul.f32 0.03125, %v663_v7  ;;  %v668_v12 = vmul.f32 %v666_v6, %v666_v6 }
 0x81d   :  { %v667_v14 = vsub.f32 %v657_v57, %v665_v10  ;;  %v670_v38 = vsel %vm122_vm2, %v668_v12, 0.0 }
 0x81e   :  { %671 = vadd.xlane.f32.xlu0 %v670_v38 }
 0x81f   :  { %v669_v15 = vmul.f32 %v667_v14, %v667_v14 }
 0x821   :  { %v673_v17 = vsel %vm122_vm2, %v669_v15, 0.0 }
 0x822   :  { %674 = vadd.xlane.f32.xlu0 %v673_v17 }
 0x8a7   :  { %v672_v24 = vpop.xlane.xlu0 %671 }
 0x8a8   :  { %v676_v25 = vmul.f32 0.03125, %v672_v24 }
 0x8aa   :  { %v678_v26 = vadd.f32 1e-05, %v676_v25 }
 0x8ab   :  { %v675_v27 = vpop.xlane.xlu0 %674 }
 0x8ac   :  { %2177 = vrsqrt.f32 %v678_v26  ;;  %v677_v28 = vmul.f32 0.03125, %v675_v27 }
 0x8ae   :  { %v679_v29 = vadd.f32 1e-05, %v677_v28  ;;  %v2576_v28 = vld [vmem:[%s2783_s4 + $0x30] ss:$8 sps:$4 sm:$0xff]  }
 0x8b0   :  { %2179 = vrsqrt.f32 %v679_v29  ;;  %v2582_v29 = vld [vmem:[%s2783_s4 + $0x20] ss:$8 sps:$4 sm:$0xff]  }
 0x8b9   :  { %v2178_v33 = vpop.eup %2177 }
 0x8ba   :  { %v682_v34 = vmul.f32 %v2178_v33, %v666_v6 }
 0x8bc   :  { %v688_v43 = vmul.f32 %v687_v21, %v682_v34 }
 0x8bd   :  { %v2180_v40 = vpop.eup %2179 }
 0x8be   :  { %v683_v42 = vmul.f32 %v2180_v40, %v667_v14  ;;  %v694_v46 = vadd.f32 %v693_v44, %v688_v43 }
 0x8c0   :  { %v689_v45 = vmul.f32 %v687_v21, %v683_v42 }
 0x8c2   :  { %v695_v47 = vadd.f32 %v693_v44, %v689_v45  ;;  %v858_v44 = vsub.s32 6, %v2334_v8 }
 0x8c4   :  { %v696_v48 = vpack.c.bf16 %v695_v47, %v694_v46 }
 0x8c6   :  { %1939 = vmatmul.mubr.msk.bf16.vlgmr.msra.gmra.mxu0 %vm122_vm2, %v696_v48  ;;  %v864_v48 = vsub.s32 7, %v2334_v8  ;;  %v2233_v8 = vld [vmem:[%s2781_s2] sm:$0xff] }
 0x8c7   :  { %1958 = vmatprep.mubr.msk.bf16.mxu0 %vm2257_vm0, %v2256_v1  ;;  %1955 = vmatpush3.bf16.msra.mxu0 %v2576_v28 }
 0x8c8   :  { %1956 = vmatprep.subr.bf16.mxu0 %v2256_v1 }
 0x8cb   :  { %1957 = vmatpush3.bf16.msra.mxu0 %v2582_v29 }
 0x986   :  { %v746_v53 = vpop.f32.mrf.mxu0 }
 0x987   :  { %v747_v54 = vadd.f32 %v746_v53, %v700_v22 }
 0x988   :  { %v1940_v61 = vpop.f32.mrf.mxu0 }
 0x989   :  { %v753_v59 = vmax.f32 %v747_v54, 0.0 }
 0x98a   :  { %v749_v50 = vpop.f32.mrf.mxu0 }
 0x98b   :  { %v750_v56 = vadd.f32 %v749_v50, %v700_v22  ;;  %v865_v22 = vrot.slane %v2377_v41, %v864_v48 }
 0x98c   :  { %v1941_v58 = vpop.f32.mrf.mxu0 }
 0x98d   :  { %v754_v60 = vmax.f32 %v750_v56, 0.0  ;;  %v2604_v56 = vld [vmem:[%s2785_s6 + $0x8] sm:$0xff] }
 0x98f   :  { %v755_v63 = vpack.c.bf16 %v754_v60, %v753_v59  ;;  %v888_v59 = vrot.slane %v2604_v56, %v2337_v9 }
 0x991   :  { %1951 = vmatmul.mubr.msk.bf16.vlgmr.msra.gmra.mxu1 %vm388_vm5, %v755_v63 }
 0xa51   :  { %v821_v62 = vpop.f32.mrf.mxu1 }
 0xa52   :  { %v822_v57 = vadd.f32 %v821_v62, %v759_v2 }
 0xa53   :  { %v1952_v3 = vpop.f32.mrf.mxu1 }
 0xa54   :  { %v828_v4 = vadd.f32 %v822_v57, %v694_v46 }
 0xa55   :  { %v824_v5 = vpop.f32.mrf.mxu1 }
 0xa56   :  { %v825_v6 = vadd.f32 %v824_v5, %v759_v2  ;;  %v830_v7 = vsel %vm122_vm2, %v828_v4, 0.0 }
 0xa57   :  { %831 = vadd.xlane.f32.xlu1 %v830_v7  ;;  %v1953_v10 = vpop.f32.mrf.mxu1 }
 0xa58   :  { %v829_v12 = vadd.f32 %v825_v6, %v695_v47  ;;  %v859_v47 = vrot.slane %v2377_v41, %v858_v44 }
 0xa5a   :  { %v833_v14 = vsel %vm122_vm2, %v829_v12, 0.0 }
 0xa5b   :  { %834 = vadd.xlane.f32.xlu0 %v833_v14 }
 0xae0   :  { %v832_v38 = vpop.xlane.xlu1 %831 }
 0xae1   :  { %v836_v15 = vmul.f32 0.03125, %v832_v38 }
 0xae3   :  { %v838_v17 = vsub.f32 %v828_v4, %v836_v15 }
 0xae4   :  { %v835_v39 = vpop.xlane.xlu0 %834 }
 0xae5   :  { %v837_v18 = vmul.f32 0.03125, %v835_v39  ;;  %v840_v20 = vmul.f32 %v838_v17, %v838_v17 }
 0xae7   :  { %v839_v24 = vsub.f32 %v829_v12, %v837_v18  ;;  %v842_v25 = vsel %vm122_vm2, %v840_v20, 0.0 }
 0xae8   :  { %843 = vadd.xlane.f32.xlu1 %v842_v25 }
 0xae9   :  { %v841_v26 = vmul.f32 %v839_v24, %v839_v24 }
 0xaeb   :  { %v845_v27 = vsel %vm122_vm2, %v841_v26, 0.0 }
 0xaec   :  { %846 = vadd.xlane.f32.xlu0 %v845_v27 }
 0xb71   :  { %v844_v33 = vpop.xlane.xlu1 %843 }
 0xb72   :  { %v848_v34 = vmul.f32 0.03125, %v844_v33 }
 0xb74   :  { %v850_v21 = vadd.f32 1e-05, %v848_v34 }
 0xb75   :  { %v847_v40 = vpop.xlane.xlu0 %846 }
 0xb76   :  { %2181 = vrsqrt.f32 %v850_v21  ;;  %v849_v42 = vmul.f32 0.03125, %v847_v40 }
 0xb78   :  { %v851_v43 = vadd.f32 1e-05, %v849_v42 }
 0xb7a   :  { %2183 = vrsqrt.f32 %v851_v43 }
 0xb83   :  { %v2182_v45 = vpop.eup %2181 }
 0xb84   :  { %v854_v46 = vmul.f32 %v2182_v45, %v838_v17 }
 0xb86   :  { %v860_v52 = vmul.f32 %v859_v47, %v854_v46 }
 0xb87   :  { %v2184_v49 = vpop.eup %2183 }
 0xb88   :  { %v855_v51 = vmul.f32 %v2184_v49, %v839_v24  ;;  %v2594_v61 = vadd.f32 %v865_v22, %v860_v52 }
 0xb8a   :  { %v861_v53 = vmul.f32 %v859_v47, %v855_v51 }
 0xb8c   :  { %v2596_v54 = vadd.f32 %v865_v22, %v861_v53 }
 0xb8e   :  { %v884_v50 = vpack.c.bf16 %v2596_v54, %v2594_v61 }
 0xb90   :  { %1959 = vmatmul.mubr.msk.bf16.vlgmr.msra.gmra.mxu0 %vm122_vm2, %v884_v50 }
 0xc50   :  { %v938_v58 = vpop.f32.mrf.mxu0 }
 0xc51   :  { %v939_v63 = vadd.f32 %v938_v58, %v888_v59 }
 0xc52   :  { %v1960_v41 = vpop.f32.mrf.mxu0 }
 0xc54   :  { %v941_v60 = vpop.f32.mrf.mxu0 }
 0xc55   :  { %v942_v2 = vadd.f32 %v941_v60, %v888_v59 }
 0xc56   :  { %v1961_v62 = vpop.f32.mrf.mxu0 }
 0xc57   :  { %v2093_v57 = vpack.i.bf16 %v942_v2, %v939_v63  ;;  %v2608_v3 = vpack.c.bf16 %v942_v2, %v939_v63 }
 0xc59   :  { %2094 = vrot.lane.b32.xlu0 %v2093_v57, %s2260_s24  ;;  %2089 = vrot.lane.b32.xlu1 %v2093_v57, %s2259_s23 }
 0xc5a   :  { %1970 = vmatprep.mubr.msk.bf16.mxu1 %vm298_vm4, %v2608_v3 }
 0xc5d   :  { %2099 = vrot.lane.b32.xlu1 %v2093_v57, %s2258_s22 }
 0xccb   :  { %v2095_v4 = vpop.permute.xlu0 %2094  ;;  %v2090_v5 = vpop.permute.xlu1 %2089 }
 0xccc   :  { %v2097_v9 = vunpack.i.h.bf16 %v2095_v4  ;;  %v2096_v6 = vunpack.i.l.bf16 %v2095_v4  ;;  %v2092_v7 = vunpack.i.h.bf16 %v2090_v5  ;;  %v2091_v10 = vunpack.i.l.bf16 %v2090_v5 }
 0xcce   :  { %v967_v12 = vpack.c.bf16 %v2097_v9, %v2096_v6  ;;  %v968_v14 = vpack.c.bf16 %v2092_v7, %v2091_v10 }
 0xccf   :  { %v2100_v38 = vpop.permute.xlu1 %2099 }
 0xcd0   :  { %v2102_v15 = vunpack.i.h.bf16 %v2100_v38  ;;  %v2101_v17 = vunpack.i.l.bf16 %v2100_v38  ;;  %977 = vrot.lane.b32.xlu0 %v967_v12, %s2261_s25  ;;  %979 = vrot.lane.b32.xlu1 %v968_v14, %s2261_s25 }
 0xcd2   :  { %v2617_v39 = vpack.c.bf16 %v2102_v15, %v2101_v17 }
 0xcd4   :  { %975 = vrot.lane.b32.xlu1 %v2617_v39, %s2261_s25  ;;  %973 = vrot.lane.b32.xlu0 %v2608_v3, %s2261_s25 }
 0xd42   :  { %v980_v18 = vpop.permute.xlu1 %979  ;;  %v978_v24 = vpop.permute.xlu0 %977 }
 0xd43   :  { %v1003_v20 = vsel %vm298_vm4, %v980_v18, 0  ;;  %2042 = vmatprep.subr.msk.bf16.mxu1 %vm298_vm4, %v980_v18  ;;  %v1000_v25 = vsel %vm298_vm4, %v978_v24, 0 }
 0xd44   :  { %1963 = vmatpush3.bf16.xpose.msra.mxu1 %v1003_v20 }
 0xd45   :  { %2043 = vmatprep.subr.msk.bf16.mxu1 %vm298_vm4, %v978_v24 }
 0xd46   :  { %v976_v26 = vpop.permute.xlu1 %975  ;;  %v974_v33 = vpop.permute.xlu0 %973 }
 0xd47   :  { %v997_v27 = vsel %vm298_vm4, %v976_v26, 0  ;;  %v994_v34 = vsel %vm298_vm4, %v974_v33, 0 }
 0xd4c   :  { %1965 = vmatpush3.bf16.xpose.msra.mxu1 %v1000_v25 }
 0xd4d   :  { %2044 = vmatprep.subr.msk.bf16.mxu1 %vm298_vm4, %v976_v26 }
 0xd54   :  { %1967 = vmatpush3.bf16.xpose.msra.mxu1 %v997_v27 }
 0xd55   :  { %2045 = vmatprep.subr.msk.bf16.mxu1 %vm298_vm4, %v974_v33 }
 0xd5c   :  { %1969 = vmatpush3.bf16.xpose.msra.mxu1 %v994_v34 }
 0xd5d   :  { %2010 = vmatprep.subr.bf16.mxu1 %v2256_v1 }
 0xd63   :  { %1971 = vmatmul.mubr.msk.bf16.vlgmr.msra.gmra.mxu1 %vm298_vm4, %v2617_v39 }
 0xd64   :  { %1974 = vmatprep.mubr.msk.bf16.mxu1 %vm298_vm4, %v967_v12 }
 0xd6b   :  { %1975 = vmatmul.mubr.msk.bf16.gmra.mxu1 %vm298_vm4, %v968_v14 }
 0xd6c   :  { %2018 = vmatprep.mubr.msk.bf16.mxu1 %vm2257_vm0, %v2256_v1 }
 0xe23   :  { %v1972_v21 = vpop.f32.mrf.mxu1 }
 0xe24   :  { %v1048_v52 = vadd.f32 %v1972_v21, %v2440_v19 }
 0xe25   :  { %v1039_v40 = vpop.f32.mrf.mxu1 }
 0xe26   :  { %v1040_v42 = vadd.f32 %v1039_v40, %v2422_v11 }
 0xe27   :  { %v1973_v43 = vpop.f32.mrf.mxu1 }
 0xe28   :  { %v1051_v45 = vadd.f32 %v1973_v43, %v2427_v13  ;;  %v1070_v46 = vsel %vm388_vm5, %v1040_v42, -inf  ;;  %v1076_v13 = vsel %vm388_vm5, %v1048_v52, -inf }
 0xe29   :  { %v1042_v47 = vpop.f32.mrf.mxu1  ;;  %1071 = vmax.xlane.f32.xlu1 %v1070_v46 }
 0xe2a   :  { %v1043_v49 = vadd.f32 %v1042_v47, %v2433_v16  ;;  %v1079_v53 = vsel %vm388_vm5, %v1051_v45, -inf }
 0xe2b   :  { %v1976_v51 = vpop.f32.mrf.mxu1 }
 0xe2c   :  { %v1073_v22 = vsel %vm388_vm5, %v1043_v49, -inf  ;;  %v1064_v16 = vadd.f32 %v1976_v51, %v2461_v35 }
 0xe2d   :  { %v1055_v50 = vpop.f32.mrf.mxu1  ;;  %1074 = vmax.xlane.f32.xlu0 %v1073_v22  ;;  %1080 = vmax.xlane.f32.xlu1 %v1079_v53 }
 0xe2e   :  { %v1056_v58 = vadd.f32 %v1055_v50, %v2449_v30  ;;  %v1088_v2 = vsel %vm388_vm5, %v1064_v16, -inf }
 0xe2f   :  { %v1977_v11 = vpop.f32.mrf.mxu1 }
 0xe30   :  { %v1067_v19 = vadd.f32 %v1977_v11, %v2466_v36  ;;  %v1082_v60 = vsel %vm388_vm5, %v1056_v58, -inf }
 0xe31   :  { %v1058_v59 = vpop.f32.mrf.mxu1  ;;  %1077 = vmax.xlane.f32.xlu0 %v1076_v13 }
 0xe32   :  { %v1059_v41 = vadd.f32 %v1058_v59, %v2454_v32  ;;  %v1091_v30 = vsel %vm388_vm5, %v1067_v19, -inf }
 0xe34   :  { %v1085_v63 = vsel %vm388_vm5, %v1059_v41, -inf }
 0xe35   :  { %1083 = vmax.xlane.f32.xlu0 %v1082_v60  ;;  %1086 = vmax.xlane.f32.xlu1 %v1085_v63 }
 0xe39   :  { %1089 = vmax.xlane.f32.xlu0 %v1088_v2  ;;  %1092 = vmax.xlane.f32.xlu1 %v1091_v30 }
 0xe4a   :  { %1166 = vrot.lane.b32.xlu1 %v967_v12, %s2262_s3 }
 0xe4f   :  { %1168 = vrot.lane.b32.xlu0 %v968_v14, %s2262_s3 }
 0xeb2   :  { %v1072_v32 = vpop.xlane.xlu1 %1071 }
 0xeb3   :  { %v1094_v4 = vsub.f32 %v1040_v42, %v1072_v32 }
 0xeb5   :  { %v1102_v10 = vmul.f32 1.442695, %v1094_v4 }
 0xeb6   :  { %v1075_v35 = vpop.xlane.xlu0 %1074  ;;  %v1081_v62 = vpop.xlane.xlu1 %1080 }
 0xeb7   :  { %v1095_v36 = vsub.f32 %v1043_v49, %v1075_v35  ;;  %v1097_v57 = vsub.f32 %v1051_v45, %v1081_v62 }
 0xeb9   :  { %v1108_v5 = vmul.f32 1.442695, %v1097_v57  ;;  %v1104_v9 = vmul.f32 1.442695, %v1095_v36 }
 0xeba   :  { %v1078_v6 = vpop.xlane.xlu0 %1077 }
 0xebb   :  { %v1096_v7 = vsub.f32 %v1048_v52, %v1078_v6  ;;  %2185 = vpow2.f32 %v1108_v5 }
 0xebc   :  { %2187 = vpow2.f32 %v1104_v9 }
 0xebd   :  { %v1106_v38 = vmul.f32 1.442695, %v1096_v7 }
 0xebe   :  { %v1084_v15 = vpop.xlane.xlu0 %1083  ;;  %v1087_v17 = vpop.xlane.xlu1 %1086 }
 0xebf   :  { %2189 = vpow2.f32 %v1106_v38  ;;  %v1098_v12 = vsub.f32 %v1056_v58, %v1084_v15  ;;  %v1099_v14 = vsub.f32 %v1059_v41, %v1087_v17 }
 0xec0   :  { %2191 = vpow2.f32 %v1102_v10 }
 0xec1   :  { %v1110_v26 = vmul.f32 1.442695, %v1098_v12  ;;  %v1112_v34 = vmul.f32 1.442695, %v1099_v14 }
 0xec2   :  { %v1090_v18 = vpop.xlane.xlu0 %1089  ;;  %v1093_v20 = vpop.xlane.xlu1 %1092 }
 0xec3   :  { %v1100_v24 = vsub.f32 %v1064_v16, %v1090_v18  ;;  %v1101_v25 = vsub.f32 %v1067_v19, %v1093_v20 }
 0xec5   :  { %v1114_v27 = vmul.f32 1.442695, %v1100_v24  ;;  %v1116_v33 = vmul.f32 1.442695, %v1101_v25 }
 0xec6   :  { %v1169_v21 = vpop.permute.xlu0 %1168  ;;  %v1167_v40 = vpop.permute.xlu1 %1166 }
 0xec7   :  { %2193 = vpow2.f32 %v1114_v27  ;;  %1978 = vmatprep.subr.bf16.mxu0 %v1169_v21 }
 0xec8   :  { %2195 = vpow2.f32 %v1116_v33  ;;  %1979 = vmatpush3.bf16.msra.mxu0 %v1169_v21  ;;  %v2186_v42 = vpop.eup %2185 }
 0xec9   :  { %2197 = vpow2.f32 %v1110_v26  ;;  %1980 = vmatprep.subr.bf16.mxu0 %v1167_v40  ;;  %v1127_v43 = vsel %vm388_vm5, %v2186_v42, 0.0  ;;  %v2188_v45 = vpop.eup %2187 }
 0xeca   :  { %2199 = vpow2.f32 %v1112_v34  ;;  %1128 = vadd.xlane.f32.xlu1 %v1127_v43  ;;  %v1121_v51 = vsel %vm388_vm5, %v2188_v45, 0.0 }
 0xecc   :  { %v2190_v46 = vpop.eup %2189  ;;  %1981 = vmatpush3.bf16.msra.mxu0 %v1167_v40 }
 0xecd   :  { %v1124_v47 = vsel %vm388_vm5, %v2190_v46, 0.0  ;;  %v2192_v49 = vpop.eup %2191 }
 0xece   :  { %1125 = vadd.xlane.f32.xlu0 %v1124_v47  ;;  %1122 = vadd.xlane.f32.xlu1 %v1121_v51  ;;  %v1118_v52 = vsel %vm388_vm5, %v2192_v49, 0.0 }
 0xed2   :  { %1119 = vadd.xlane.f32.xlu0 %v1118_v52 }
 0xed4   :  { %v2194_v22 = vpop.eup %2193 }
 0xed5   :  { %v2196_v53 = vpop.eup %2195  ;;  %v1136_v50 = vsel %vm388_vm5, %v2194_v22, 0.0 }
 0xed6   :  { %v2198_v11 = vpop.eup %2197  ;;  %1137 = vadd.xlane.f32.xlu0 %v1136_v50  ;;  %v1139_v58 = vsel %vm388_vm5, %v2196_v53, 0.0 }
 0xed7   :  { %v2200_v13 = vpop.eup %2199  ;;  %1140 = vadd.xlane.f32.xlu1 %v1139_v58  ;;  %v1130_v59 = vsel %vm388_vm5, %v2198_v11, 0.0 }
 0xed8   :  { %v1133_v41 = vsel %vm388_vm5, %v2200_v13, 0.0 }
 0xeda   :  { %1131 = vadd.xlane.f32.xlu0 %v1130_v59 }
 0xedb   :  { %1134 = vadd.xlane.f32.xlu1 %v1133_v41 }
 0xeec   :  { %1164 = vrot.lane.b32.xlu1 %v2617_v39, %s2262_s3 }
 0xef0   :  { %1162 = vrot.lane.b32.xlu0 %v2608_v3, %s2262_s3  ;;  %1288 = vrot.lane.b32.xlu1 %v2576_v28, %s2263_s18 }
 0xf53   :  { %v1129_v16 = vpop.xlane.xlu1 %1128 }
 0xf57   :  { %v1126_v19 = vpop.xlane.xlu0 %1125  ;;  %v1123_v60 = vpop.xlane.xlu1 %1122 }
 0xf58   :  { %2201 = vrcp.f32 %v1123_v60 }
 0xf59   :  { %2203 = vrcp.f32 %v1126_v19 }
 0xf5b   :  { %v1120_v63 = vpop.xlane.xlu0 %1119 }
 0xf5c   :  { %2205 = vrcp.f32 %v1120_v63 }
 0xf5d   :  { %2207 = vrcp.f32 %v1129_v16 }
 0xf5f   :  { %v1138_v2 = vpop.xlane.xlu0 %1137 }
 0xf60   :  { %v1141_v30 = vpop.xlane.xlu1 %1140  ;;  %2209 = vrcp.f32 %v1138_v2 }
 0xf61   :  { %2211 = vrcp.f32 %v1141_v30 }
 0xf63   :  { %v1132_v32 = vpop.xlane.xlu0 %1131 }
 0xf64   :  { %2213 = vrcp.f32 %v1132_v32  ;;  %v1135_v39 = vpop.xlane.xlu1 %1134 }
 0xf65   :  { %2215 = vrcp.f32 %v1135_v39  ;;  %v2202_v3 = vpop.eup %2201  ;;  %v1285_v39 = vrot.slane %v2604_v56, %v2517_v55 }
 0xf66   :  { %v2204_v35 = vpop.eup %2203  ;;  %v1151_v5 = vmul.f32 %v2202_v3, %v2188_v45 }
 0xf67   :  { %v1163_v57 = vpop.permute.xlu0 %1162  ;;  %v1152_v9 = vmul.f32 %v2204_v35, %v2190_v46 }
 0xf68   :  { %v1165_v62 = vpop.permute.xlu1 %1164 }
 0xf69   :  { %v2206_v28 = vpop.eup %2205  ;;  %1982 = vmatprep.subr.bf16.mxu0 %v1165_v62 }
 0xf6a   :  { %v2208_v36 = vpop.eup %2207  ;;  %1983 = vmatpush3.bf16.msra.mxu0 %v1165_v62  ;;  %v1150_v4 = vmul.f32 %v2206_v28, %v2192_v49 }
 0xf6b   :  { %1984 = vmatprep.subr.bf16.mxu0 %v1163_v57  ;;  %v1153_v7 = vmul.f32 %v2208_v36, %v2186_v42 }
 0xf6c   :  { %v1158_v6 = vpack.c.bf16 %v1151_v5, %v1150_v4  ;;  %v1289_v27 = vpop.permute.xlu1 %1288 }
 0xf6d   :  { %v2210_v10 = vpop.eup %2209  ;;  %v1159_v38 = vpack.c.bf16 %v1153_v7, %v1152_v9 }
 0xf6e   :  { %1985 = vmatpush3.bf16.msra.mxu0 %v1163_v57  ;;  %1986 = vmatprep.mubr.msk.bf16.mxu0 %vm388_vm5, %v1158_v6  ;;  %v2212_v15 = vpop.eup %2211  ;;  %v1156_v20 = vmul.f32 %v2210_v10, %v2194_v22 }
 0xf6f   :  { %1994 = vmatprep.subr.bf16.mxu0 %v2256_v1  ;;  %v1157_v24 = vmul.f32 %v2212_v15, %v2196_v53 }
 0xf71   :  { %v2214_v17 = vpop.eup %2213  ;;  %1987 = vmatmul.mubr.msk.bf16.vlgmr.msra.gmra.mxu0 %vm388_vm5, %v1159_v38  ;;  %v1161_v26 = vpack.c.bf16 %v1157_v24, %v1156_v20  ;;  %v2136_v24 = vld [vmem:[%s2783_s4 + $0x24] ss:$8 sps:$4 sm:$0xff]  }
 0xf72   :  { %v2216_v12 = vpop.eup %2215  ;;  %v1154_v14 = vmul.f32 %v2214_v17, %v2198_v11  ;;  %1995 = vmatpush3.bf16.msra.mxu0 %v1289_v27 }
 0xf73   :  { %v1155_v18 = vmul.f32 %v2216_v12, %v2200_v13  ;;  %1996 = vmatprep.subr.bf16.mxu0 %v2256_v1 }
 0xf75   :  { %v1160_v25 = vpack.c.bf16 %v1155_v18, %v1154_v14 }
 0xf77   :  { %1990 = vmatprep.mubr.msk.bf16.mxu0 %vm388_vm5, %v1160_v25  ;;  %v2137_v25 = vld [vmem:[%s2784_s5 + $0x38] sm:$0xff]  }
 0xf78   :  { %2011 = vmatpush3.bf16.msra.mxu1 %v2137_v25 }
 0xf79   :  { %1991 = vmatmul.mubr.msk.bf16.gmra.mxu0 %vm388_vm5, %v1161_v26  ;;  %2012 = vmatprep.subr.bf16.mxu1 %v2256_v1 }
 0xf7a   :  { %1998 = vmatprep.mubr.msk.bf16.mxu0 %vm2257_vm0, %v2256_v1 }
0x1031   :  { %v1988_v33 = vpop.f32.mrf.mxu0 }
0x1033   :  { %v1220_v34 = vpop.f32.mrf.mxu0 }
0x1035   :  { %v1989_v21 = vpop.f32.mrf.mxu0 }
0x1036   :  { %v2103_v40 = vpack.i.bf16 %v1989_v21, %v1988_v33 }
0x1037   :  { %v1223_v42 = vpop.f32.mrf.mxu0 }
0x1038   :  { %2104 = vrot.lane.b32.xlu0 %v2103_v40, %s2264_s19 }
0x1039   :  { %v1992_v43 = vpop.f32.mrf.mxu0 }
0x103b   :  { %v1236_v45 = vpop.f32.mrf.mxu0 }
0x103d   :  { %v1993_v46 = vpop.f32.mrf.mxu0 }
0x103e   :  { %v2108_v47 = vpack.i.bf16 %v1993_v46, %v1992_v43 }
0x103f   :  { %v1239_v49 = vpop.f32.mrf.mxu0 }
0x1040   :  { %v2113_v51 = vpack.i.bf16 %v1239_v49, %v1236_v45  ;;  %2109 = vrot.lane.b32.xlu0 %v2108_v47, %s2265_s20  ;;  %v1367_v45 = vrot.slane %v2604_v56, %v2540_v31 }
0x1042   :  { %2114 = vrot.lane.b32.xlu1 %v2113_v51, %s2266_s21  ;;  %v1373_v51 = vrot.slane %v2604_v56, %v692_v37  ;;  %v2139_v37 = vld [vmem:[%s2784_s5 + $0x28] sm:$0xff]  }
0x1046   :  { %1286 = vrot.lane.b32.xlu1 %v2582_v29, %s2263_s18 }
0x10aa   :  { %v2105_v52 = vpop.permute.xlu0 %2104 }
0x10ab   :  { %v2107_v22 = vunpack.i.h.bf16 %v2105_v52  ;;  %v2106_v53 = vunpack.i.l.bf16 %v2105_v52 }
0x10ad   :  { %v1275_v59 = vsel %vm298_vm4, %v1220_v34, %v2106_v53  ;;  %v1276_v41 = vsel %vm298_vm4, %v1223_v42, %v2107_v22 }
0x10b2   :  { %v2110_v50 = vpop.permute.xlu0 %2109 }
0x10b3   :  { %v2112_v16 = vunpack.i.h.bf16 %v2110_v50  ;;  %v2111_v19 = vunpack.i.l.bf16 %v2110_v50 }
0x10b4   :  { %v2115_v11 = vpop.permute.xlu1 %2114 }
0x10b5   :  { %v2117_v58 = vunpack.i.h.bf16 %v2115_v11  ;;  %v2116_v13 = vunpack.i.l.bf16 %v2115_v11  ;;  %v2138_v11 = vld [vmem:[%s2784_s5 + $0x30] sm:$0xff]  }
0x10b6   :  { %2013 = vmatpush3.bf16.msra.mxu1 %v2138_v11 }
0x10b7   :  { %v1278_v60 = vsel %vm58_vm1, %v1276_v41, %v2117_v58  ;;  %v1277_v63 = vsel %vm58_vm1, %v1275_v59, %v2116_v13  ;;  %2014 = vmatprep.subr.bf16.mxu1 %v2256_v1  ;;  %v2140_v58 = vld [vmem:[%s2784_s5 + $0x20] sm:$0xff]   ;;  %v1380_v13 = vrot.slane %v2604_v56, %v2358_v23 }
0x10b8   :  { %v1280_v2 = vsel %vm598_vm6, %v1278_v60, %v2112_v16  ;;  %v1279_v29 = vsel %vm598_vm6, %v1277_v63, %v2111_v19  ;;  %v1287_v30 = vpop.permute.xlu1 %1286 }
0x10b9   :  { %v1281_v32 = vpack.c.bf16 %v1280_v2, %v1279_v29  ;;  %1997 = vmatpush3.bf16.msra.mxu0 %v1287_v30 }
0x10ba   :  { %2002 = vmatprep.subr.bf16.mxu0 %v2256_v1  ;;  %2015 = vmatpush3.bf16.msra.mxu1 %v2139_v37 }
0x10bb   :  { %2016 = vmatprep.subr.bf16.mxu1 %v2256_v1 }
0x10bc   :  { %1999 = vmatmul.mubr.msk.bf16.vlgmr.msra.gmra.mxu0 %vm122_vm2, %v1281_v32  ;;  %v1439_v32 = vrot.slane %v2604_v56, %v758_v0 }
0x10bd   :  { %2006 = vmatprep.mubr.msk.bf16.mxu0 %vm2257_vm0, %v2256_v1 }
0x10be   :  { %2017 = vmatpush3.bf16.msra.mxu1 %v2140_v58 }
0x10bf   :  { %2030 = vmatprep.subr.bf16.mxu1 %v2256_v1 }
0x117c   :  { %v1329_v3 = vpop.f32.mrf.mxu0 }
0x117d   :  { %v1330_v35 = vadd.f32 %v1329_v3, %v1285_v39 }
0x117e   :  { %v2000_v62 = vpop.f32.mrf.mxu0 }
0x117f   :  { %v1336_v28 = vadd.f32 %v1330_v35, %v2594_v61 }
0x1180   :  { %v1332_v36 = vpop.f32.mrf.mxu0 }
0x1181   :  { %v1333_v57 = vadd.f32 %v1332_v36, %v1285_v39  ;;  %v1338_v4 = vsel %vm122_vm2, %v1336_v28, 0.0 }
0x1182   :  { %1339 = vadd.xlane.f32.xlu0 %v1338_v4  ;;  %v2001_v5 = vpop.f32.mrf.mxu0 }
0x1183   :  { %v1337_v9 = vadd.f32 %v1333_v57, %v2596_v54  ;;  %v2135_v54 = vld [vmem:[%s2783_s4 + $0x34] ss:$8 sps:$4 sm:$0xff]  }
0x1184   :  { %2003 = vmatpush3.bf16.msra.mxu0 %v2135_v54 }
0x1185   :  { %v1341_v6 = vsel %vm122_vm2, %v1337_v9, 0.0  ;;  %2004 = vmatprep.subr.bf16.mxu0 %v2256_v1 }
0x1186   :  { %1342 = vadd.xlane.f32.xlu1 %v1341_v6 }
0x1188   :  { %2005 = vmatpush3.bf16.msra.mxu0 %v2136_v24 }
0x1189   :  { %2022 = vmatprep.subr.bf16.mxu0 %v2256_v1 }
0x120b   :  { %v1340_v7 = vpop.xlane.xlu0 %1339 }
0x120c   :  { %v1344_v10 = vmul.f32 0.03125, %v1340_v7 }
0x120e   :  { %v1346_v38 = vsub.f32 %v1336_v28, %v1344_v10 }
0x120f   :  { %v1343_v15 = vpop.xlane.xlu1 %1342 }
0x1210   :  { %v1345_v17 = vmul.f32 0.03125, %v1343_v15  ;;  %v1348_v12 = vmul.f32 %v1346_v38, %v1346_v38 }
0x1212   :  { %v1347_v14 = vsub.f32 %v1337_v9, %v1345_v17  ;;  %v1350_v61 = vsel %vm122_vm2, %v1348_v12, 0.0 }
0x1213   :  { %1351 = vadd.xlane.f32.xlu0 %v1350_v61  ;;  %v2141_v61 = vld [vmem:[%s2780_s1 + $0x20] sm:$0xff]  }
0x1214   :  { %v1349_v18 = vmul.f32 %v1347_v14, %v1347_v14 }
0x1216   :  { %v1353_v20 = vsel %vm122_vm2, %v1349_v18, 0.0  ;;  %v2142_v18 = vld [vmem:[%s2780_s1 + $0x18] sm:$0xff]  }
0x1217   :  { %1354 = vadd.xlane.f32.xlu0 %v1353_v20 }
0x129c   :  { %v1352_v26 = vpop.xlane.xlu0 %1351 }
0x129d   :  { %v1356_v27 = vmul.f32 0.03125, %v1352_v26 }
0x129f   :  { %v1358_v33 = vadd.f32 1e-05, %v1356_v27 }
0x12a0   :  { %v1355_v34 = vpop.xlane.xlu0 %1354 }
0x12a1   :  { %2217 = vrsqrt.f32 %v1358_v33  ;;  %v1357_v21 = vmul.f32 0.03125, %v1355_v34 }
0x12a3   :  { %v1359_v40 = vadd.f32 1e-05, %v1357_v21  ;;  %v1539_v21 = vrot.slane %v2604_v56, %v858_v44  ;;  %v2144_v44 = vld [vmem:[%s2780_s1 + $0x28] sm:$0xff]  }
0x12a5   :  { %2219 = vrsqrt.f32 %v1359_v40 }
0x12ae   :  { %v2218_v42 = vpop.eup %2217 }
0x12af   :  { %v1362_v43 = vmul.f32 %v2218_v42, %v1346_v38 }
0x12b1   :  { %v1368_v49 = vmul.f32 %v1367_v45, %v1362_v43 }
0x12b2   :  { %v2220_v46 = vpop.eup %2219 }
0x12b3   :  { %v1363_v47 = vmul.f32 %v2220_v46, %v1347_v14  ;;  %v1374_v22 = vadd.f32 %v1373_v51, %v1368_v49 }
0x12b5   :  { %v1369_v52 = vmul.f32 %v1367_v45, %v1363_v47  ;;  %v1545_v45 = vrot.slane %v2604_v56, %v864_v48  ;;  %v1552_v48 = vrot.slane %v2233_v8, %v2517_v55 }
0x12b7   :  { %v1375_v53 = vadd.f32 %v1373_v51, %v1369_v52  ;;  %v2143_v52 = vld [vmem:[%s2780_s1 + $0x30] sm:$0xff]   ;;  %s2267_s1 = smov [#allocation2]  }
0x12b8   :  { %s1729_s2 = sshll.u32 %s2267_s1, 4  ;;  %s1730_s2 = int_to_ptr.vmem [resolvable:$true] %s1729_s2 }
0x12b9   :  { %v1376_v50 = vpack.c.bf16 %v1375_v53, %v1374_v22  ;;  %s2234_s14 = scalar_lea.vmem %s1730_s2, 32  ;;  %p2239_p1 = scmp.lt.s32.totalorder %s1730_s2, %s1730_s2 }
0x12ba   :  { %p2235_p0 = scmp.ne.s32.totalorder %s1730_s2, %s2234_s14  ;;  %p2240_p2 = scmp.lt.s32.totalorder %s2234_s14, %s2234_s14 }
0x12bb   :  { %2007 = vmatmul.mubr.msk.bf16.vlgmr.msra.gmra.mxu0 %vm122_vm2, %v1376_v50 }
0x12bc   :  { %2026 = vmatprep.mubr.msk.bf16.mxu0 %vm2257_vm0, %v2256_v1  ;;  %2023 = vmatpush3.bf16.msra.mxu0 %v2141_v61  ;;  %p2241_p3 = por %p2240_p2, %p2239_p1 }
0x12bd   :  { %2024 = vmatprep.subr.bf16.mxu0 %v2256_v1 }
0x12be   :  { %p2242_p4 = pnand %p2241_p3, %p2235_p0 }
0x12c0   :  { %2025 = vmatpush3.bf16.msra.mxu0 %v2142_v18 }
0x137b   :  { %v1426_v59 = vpop.f32.mrf.mxu0 }
0x137c   :  { %v1427_v16 = vadd.f32 %v1426_v59, %v1380_v13  ;;  %v1615_v59 = vrot.slane %v2233_v8, %v2540_v31 }
0x137d   :  { %v2008_v41 = vpop.f32.mrf.mxu0 }
0x137e   :  { %v1433_v2 = vmax.f32 %v1427_v16, 0.0 }
0x137f   :  { %v1429_v19 = vpop.f32.mrf.mxu0 }
0x1380   :  { %v1430_v60 = vadd.f32 %v1429_v19, %v1380_v13 }
0x1381   :  { %v2009_v63 = vpop.f32.mrf.mxu0 }
0x1382   :  { %v1434_v29 = vmax.f32 %v1430_v60, 0.0 }
0x1384   :  { %v1435_v30 = vpack.c.bf16 %v1434_v29, %v1433_v2 }
0x1386   :  { %2019 = vmatmul.mubr.msk.bf16.vlgmr.msra.gmra.mxu1 %vm388_vm5, %v1435_v30 }
0x1387   :  { %2034 = vmatprep.mubr.msk.bf16.mxu1 %vm2257_vm0, %v2256_v1  ;;  %2031 = vmatpush3.bf16.msra.mxu1 %v2143_v52 }
0x1388   :  { %2032 = vmatprep.subr.bf16.mxu1 %v2256_v1 }
0x138b   :  { %2033 = vmatpush3.bf16.msra.mxu1 %v2144_v44 }
0x1446   :  { %v1501_v39 = vpop.f32.mrf.mxu1 }
0x1447   :  { %v1502_v23 = vadd.f32 %v1501_v39, %v1439_v32 }
0x1448   :  { %v2020_v3 = vpop.f32.mrf.mxu1 }
0x1449   :  { %v1508_v35 = vadd.f32 %v1502_v23, %v1374_v22 }
0x144a   :  { %v1504_v62 = vpop.f32.mrf.mxu1 }
0x144b   :  { %v1505_v28 = vadd.f32 %v1504_v62, %v1439_v32  ;;  %v1510_v36 = vsel %vm122_vm2, %v1508_v35, 0.0 }
0x144c   :  { %1511 = vadd.xlane.f32.xlu1 %v1510_v36  ;;  %v2021_v57 = vpop.f32.mrf.mxu1 }
0x144d   :  { %v1509_v4 = vadd.f32 %v1505_v28, %v1375_v53 }
0x144f   :  { %v1513_v5 = vsel %vm122_vm2, %v1509_v4, 0.0 }
0x1450   :  { %1514 = vadd.xlane.f32.xlu0 %v1513_v5 }
0x14d5   :  { %v1512_v9 = vpop.xlane.xlu1 %1511 }
0x14d6   :  { %v1516_v6 = vmul.f32 0.03125, %v1512_v9 }
0x14d8   :  { %v1518_v7 = vsub.f32 %v1508_v35, %v1516_v6 }
0x14d9   :  { %v1515_v10 = vpop.xlane.xlu0 %1514 }
0x14da   :  { %v1517_v38 = vmul.f32 0.03125, %v1515_v10  ;;  %v1520_v0 = vmul.f32 %v1518_v7, %v1518_v7 }
0x14dc   :  { %v1519_v15 = vsub.f32 %v1509_v4, %v1517_v38  ;;  %v1522_v17 = vsel %vm122_vm2, %v1520_v0, 0.0 }
0x14dd   :  { %1523 = vadd.xlane.f32.xlu1 %v1522_v17 }
0x14de   :  { %v1521_v12 = vmul.f32 %v1519_v15, %v1519_v15 }
0x14e0   :  { %v1525_v14 = vsel %vm122_vm2, %v1521_v12, 0.0 }
0x14e1   :  { %1526 = vadd.xlane.f32.xlu0 %v1525_v14 }
0x1566   :  { %v1524_v20 = vpop.xlane.xlu1 %1523 }
0x1567   :  { %v1528_v54 = vmul.f32 0.03125, %v1524_v20 }
0x1569   :  { %v1530_v24 = vadd.f32 1e-05, %v1528_v54 }
0x156a   :  { %v1527_v25 = vpop.xlane.xlu0 %1526 }
0x156b   :  { %2221 = vrsqrt.f32 %v1530_v24  ;;  %v1529_v26 = vmul.f32 0.03125, %v1527_v25 }
0x156d   :  { %v1531_v27 = vadd.f32 1e-05, %v1529_v26 }
0x156f   :  { %2223 = vrsqrt.f32 %v1531_v27 }
0x1578   :  { %v2222_v33 = vpop.eup %2221 }
0x1579   :  { %v1534_v34 = vmul.f32 %v2222_v33, %v1518_v7 }
0x157b   :  { %v1540_v43 = vmul.f32 %v1539_v21, %v1534_v34 }
0x157c   :  { %v2224_v40 = vpop.eup %2223 }
0x157d   :  { %v1535_v42 = vmul.f32 %v2224_v40, %v1519_v15  ;;  %v1546_v47 = vadd.f32 %v1545_v45, %v1540_v43 }
0x157f   :  { %v1541_v46 = vmul.f32 %v1539_v21, %v1535_v42 }
0x1581   :  { %v1547_v49 = vadd.f32 %v1545_v45, %v1541_v46 }
0x1583   :  { %v1548_v51 = vpack.c.bf16 %v1547_v49, %v1546_v47 }
0x1585   :  { %2027 = vmatmul.mubr.msk.bf16.vlgmr.msra.gmra.mxu0 %vm122_vm2, %v1548_v51 }
0x1645   :  { %v1602_v56 = vpop.f32.mrf.mxu0 }
0x1646   :  { %v1603_v53 = vadd.f32 %v1602_v56, %v1552_v48 }
0x1647   :  { %v2028_v22 = vpop.f32.mrf.mxu0 }
0x1648   :  { %v1609_v58 = vmax.f32 %v1603_v53, 0.0 }
0x1649   :  { %v1605_v50 = vpop.f32.mrf.mxu0 }
0x164a   :  { %v1606_v11 = vadd.f32 %v1605_v50, %v1552_v48 }
0x164b   :  { %v2029_v37 = vpop.f32.mrf.mxu0 }
0x164c   :  { %v1610_v13 = vmax.f32 %v1606_v11, 0.0 }
0x164e   :  { %v1611_v1 = vpack.c.bf16 %v1610_v13, %v1609_v58 }
0x1650   :  { %2035 = vmatmul.mubr.msk.bf16.vlgmr.msra.gmra.mxu1 %vm122_vm2, %v1611_v1 }
0x1710   :  { %v1665_v41 = vpop.f32.mrf.mxu1 }
0x1711   :  { %v1666_v16 = vadd.f32 %v1665_v41, %v1615_v59 }
0x1712   :  { %v2036_v19 = vpop.f32.mrf.mxu1 }
0x1713   :  { %v1672_v60 = vmax.f32 %v1666_v16, 0.0 }
0x1714   :  { %v1668_v63 = vpop.f32.mrf.mxu1 }
0x1715   :  { %v1675_v55 = vsel %vm1674_vm7, %v1672_v60, -inf  ;;  %v1669_v2 = vadd.f32 %v1668_v63, %v1615_v59 }
0x1716   :  { %v1676_v29 = vrot.slane %v1675_v55, 4  ;;  %v2037_v30 = vpop.f32.mrf.mxu1 }
0x1717   :  { %v1673_v32 = vmax.f32 %v1669_v2, 0.0 }
0x1718   :  { %v1677_v39 = vmax.f32 %v1675_v55, %v1676_v29 }
0x1719   :  { %v1694_v23 = vsel %vm1674_vm7, %v1673_v32, -inf }
0x171a   :  { %v1678_v3 = vrot.slane %v1677_v39, 2  ;;  %v1695_v35 = vrot.slane %v1694_v23, 4 }
0x171c   :  { %v1679_v62 = vmax.f32 %v1677_v39, %v1678_v3  ;;  %v1696_v28 = vmax.f32 %v1694_v23, %v1695_v35 }
0x171e   :  { %v1680_v31 = vrot.slane %v1679_v62, 1  ;;  %v1697_v36 = vrot.slane %v1696_v28, 2 }
0x1720   :  { %v1681_v57 = vmax.f32 %v1679_v62, %v1680_v31  ;;  %v1698_v4 = vmax.f32 %v1696_v28, %v1697_v36 }
0x1722   :  { %v1682_v5 = vsub.f32 %v1672_v60, %v1681_v57  ;;  %v1699_v9 = vrot.slane %v1698_v4, 1 }
0x1724   :  { %v1683_v6 = vmul.f32 1.442695, %v1682_v5  ;;  %v1700_v7 = vmax.f32 %v1698_v4, %v1699_v9 }
0x1726   :  { %2225 = vpow2.f32 %v1683_v6  ;;  %v1701_v10 = vsub.f32 %v1673_v32, %v1700_v7 }
0x1728   :  { %v1702_v38 = vmul.f32 1.442695, %v1701_v10 }
0x172a   :  { %2227 = vpow2.f32 %v1702_v38 }
0x1733   :  { %v2226_v0 = vpop.eup %2225 }
0x1734   :  { %v1685_v15 = vsel %vm1674_vm7, %v2226_v0, 0.0 }
0x1735   :  { %v1686_v17 = vrot.slane %v1685_v15, 4 }
0x1737   :  { %v2228_v12 = vpop.eup %2227  ;;  %v1687_v14 = vadd.f32 %v1686_v17, %v1685_v15 }
0x1738   :  { %v1704_v61 = vsel %vm1674_vm7, %v2228_v12, 0.0 }
0x1739   :  { %v1688_v18 = vrot.slane %v1687_v14, 2  ;;  %v1705_v20 = vrot.slane %v1704_v61, 4 }
0x173b   :  { %v1689_v54 = vadd.f32 %v1688_v18, %v1687_v14  ;;  %v1706_v24 = vadd.f32 %v1705_v20, %v1704_v61 }
0x173d   :  { %v1690_v25 = vrot.slane %v1689_v54, 1  ;;  %v1707_v26 = vrot.slane %v1706_v24, 2 }
0x173f   :  { %v1691_v27 = vadd.f32 %v1690_v25, %v1689_v54  ;;  %v1708_v33 = vadd.f32 %v1707_v26, %v1706_v24 }
0x1741   :  { %2229 = vrcp.f32 %v1691_v27  ;;  %v1709_v34 = vrot.slane %v1708_v33, 1 }
0x1743   :  { %v1710_v21 = vadd.f32 %v1709_v34, %v1708_v33 }
0x1745   :  { %2231 = vrcp.f32 %v1710_v21 }
0x174e   :  { %v2230_v40 = vpop.eup %2229 }
0x174f   :  { %v1693_v42 = vmul.f32 %v2230_v40, %v2226_v0 }
0x1751   :  { %v1714_v46 = vrot.slane %v1693_v42, 7 }
0x1752   :  { %v2232_v43 = vpop.eup %2231 }
0x1753   :  { %v1712_v45 = vmul.f32 %v2232_v43, %v2228_v12 }
0x1755   :  { %v1717_v47 = vrot.slane %v1712_v45, 6 }
0x1757   :  { %v1720_v49 = vsel %vm1719_vm8, %v1714_v46, %v1717_v47 }
0x1758   :  { %1722 = vst.msk [vmem:[#allocation2] sm:$0x3] %vm1721_vm9, %v1720_v49 }
0x1759   :  { %2245 = shalt.err (!%p2242_p4)
}
0x175a   :  { %1732 = dma.vmem_to_hbm [thread:$0]  %s1730_s2, 32, %s2786_s7, [#allocation3]  }
0x175b   :  { %2254 = dma.done.wait [#allocation3], 32  }
0x175c   :  { %2255 = vsyncadd [#allocation3], 4294967264 }
0x175d   :  { %1736 = vsyncpa [#allocation3], 1 }

</bundles_post_ra>
